<compile_context>
chip_gen: v7x
topology: tpu7x:2x2x1
jax: 0.10.0
libtpu: 0.0.40
codegen_flags: <defaults>
</compile_context>

<pallas_src>
import math
from dataclasses import dataclass
from functools import partial

import jax
import jax.numpy as jnp
from jax import lax
from jax.experimental import pallas as pl
from jax.experimental.pallas import tpu as pltpu


# ----------------------------- config ---------------------------------------
@dataclass(frozen=True)
class Config:
    vocab_size: int = 64
    embed_dim: int = 32
    mlp_dim: int = 64
    n_layers: int = 2


def _round_up_lanes(n: int) -> int:
    return max(128, ((n + 127) // 128) * 128)


# ----------------------------- fused kernel ----------------------------------
def _make_kernel(n_layers: int, S: int, EP: int, return_hidden: bool):
    """Builds the fused forward kernel for one batch element per grid step.

    Ref shapes (lane-dense, padded to multiples of 128 on the last dim):
      tokens_ref (B*S,)  int32, SMEM (scalar prefetch)
      emb_ref    (V, EP) f32     embedding table (pad lanes zero)
      wqkv_ref   (L, EP, 3*EP)   bf16, packed Q|K|V (1/sqrt(E) folded into Q slice)
      bqkv_ref   (L, 1, 3*EP)    f32
      wfc_ref    (L, EP, MP) bf16   bfc_ref (L, 1, MP) f32
      wfo_ref    (L, MP, EP) bf16   bfo_ref (L, 1, EP) f32
      wout_ref   (EP, VP)    bf16 (tied embedding.T)   bout_ref (1, VP) f32
      out_ref    (S, VP) or (S, EP) f32
      h_scratch  (S, EP) f32
    """

    def kernel(tokens_ref, emb_ref, wqkv_ref, bqkv_ref, wfc_ref, bfc_ref,
               wfo_ref, bfo_ref, wout_ref, bout_ref, out_ref, h_scratch):
        b = pl.program_id(0)

        # ---- fused embedding gather: dynamic sublane row loads from the VMEM table ----
        for s in range(S):
            tok = tokens_ref[b * S + s]                       # scalar read from SMEM
            h_scratch[pl.ds(s, 1), :] = emb_ref[pl.ds(tok, 1), :]
        h = h_scratch[...]                                    # (S, EP) f32

        # ---- causal mask built in-kernel (no O(S^2) operand DMA); hoisted over layers ----
        row = lax.broadcasted_iota(jnp.int32, (S, S), 0)
        col = lax.broadcasted_iota(jnp.int32, (S, S), 1)
        mask = jnp.where(col <= row, 0.0, -1e30).astype(jnp.float32)

        for l in range(n_layers):          # static unroll; weights stay VMEM-resident
            # ---- fused QKV projection: one bf16 MXU matmul per layer, f32 accumulate ----
            qkv = jnp.dot(h.astype(jnp.bfloat16), wqkv_ref[l],
                          preferred_element_type=jnp.float32) + bqkv_ref[l]
            q = qkv[:, 0 * EP:1 * EP]      # 128-lane tile-aligned slices
            k = qkv[:, 1 * EP:2 * EP]
            v = qkv[:, 2 * EP:3 * EP]

            # ---- scores: contract last dims (no transpose); 1/sqrt(E) pre-folded into Wq ----
            s_ = lax.dot_general(q.astype(jnp.bfloat16), k.astype(jnp.bfloat16),
                                 (((1,), (1,)), ((), ())),
                                 preferred_element_type=jnp.float32)
            s_ = s_ + mask

            # ---- numerically stable softmax; divide moved onto the EUP ----
            m = jnp.max(s_, axis=-1, keepdims=True)
            e = jnp.exp(s_ - m)
            denom = jnp.sum(e, axis=-1, keepdims=True)        # >= 1 (diagonal unmasked)
            r = pl.reciprocal(denom, approx=True)
            r = r * (2.0 - denom * r)      # one Newton step -> f32-accurate reciprocal
            p = e * r

            attn = jnp.dot(p.astype(jnp.bfloat16), v.astype(jnp.bfloat16),
                           preferred_element_type=jnp.float32)
            h = h + attn                                            # residual 1

            # ---- MLP (bf16 operands, f32 accumulate / residual) ----
            hid = jnp.maximum(
                jnp.dot(h.astype(jnp.bfloat16), wfc_ref[l],
                        preferred_element_type=jnp.float32) + bfc_ref[l], 0.0)
            h = h + (jnp.dot(hid.astype(jnp.bfloat16), wfo_ref[l],
                             preferred_element_type=jnp.float32) + bfo_ref[l])  # residual 2

        if return_hidden:
            out_ref[...] = h
        else:
            # tied output projection; logits output is lane-dense (VP = 128)
            out_ref[...] = (jnp.dot(h.astype(jnp.bfloat16), wout_ref[...],
                                    preferred_element_type=jnp.float32) + bout_ref[...])

    return kernel


def _const_spec(a):
    """Whole-array block, same block for every grid step (weights stay resident)."""
    n = a.ndim
    return pl.BlockSpec(a.shape, lambda *_args, _n=n: (0,) * _n)


# ----------------------------- wrapper ---------------------------------------
@partial(jax.jit, static_argnames=("cfg", "last_hidden_state"))
def simple_llm_forward(tokens, packed, cfg: Config, last_hidden_state=False):
    B, S = tokens.shape
    E, V = cfg.embed_dim, cfg.vocab_size
    EP, VP = _round_up_lanes(E), _round_up_lanes(V)
    out_w = EP if last_hidden_state else VP

    kernel = _make_kernel(cfg.n_layers, S, EP, last_hidden_state)
    args = (packed["emb_pad"], packed["wqkv"], packed["bqkv"], packed["wfc"],
            packed["bfc"], packed["wfo"], packed["bfo"], packed["wout"], packed["bout"])

    grid_spec = pltpu.PrefetchScalarGridSpec(
        num_scalar_prefetch=1,                 # tokens -> SMEM, readable per-scalar
        grid=(B,),                             # per-batch attention; v7x megacore splits it
        in_specs=[_const_spec(a) for a in args],
        out_specs=pl.BlockSpec((S, out_w), lambda b, tok: (b, 0)),
        scratch_shapes=[pltpu.VMEM((S, EP), jnp.float32)],
    )
    out = pl.pallas_call(
        kernel,
        out_shape=jax.ShapeDtypeStruct((B * S, out_w), jnp.float32),
        grid_spec=grid_spec,
        compiler_params=pltpu.CompilerParams(dimension_semantics=("parallel",)),
    )(tokens.reshape(-1).astype(jnp.int32), *args)

    if last_hidden_state:
        return out[:, :E].reshape(B, S, E)
    return out[:, :V].reshape(B, S, V)
    # TODO(synk): cross-entropy loss path (y is not None) not implemented; logits only.


# ----------------------------- parameter init & packing ----------------------
def init_params(cfg: Config, key):
    """PyTorch-style parameters (weights stored (in_features, out_features))."""
    V, E, M = cfg.vocab_size, cfg.embed_dim, cfg.mlp_dim
    keys = iter(jax.random.split(key, 4 + 10 * cfg.n_layers))

    embedding = jax.random.normal(next(keys), (V, E), jnp.float32)   # nn.Embedding ~ N(0,1)
    layers = []
    for _ in range(cfg.n_layers):
        lp = {}
        for name, in_f, out_f in (("q", E, E), ("k", E, E), ("v", E, E),
                                  ("fc", E, M), ("fo", M, E)):
            bound = 1.0 / math.sqrt(in_f)
            lp["w" + name] = jax.random.uniform(next(keys), (in_f, out_f), jnp.float32,
                                                -bound, bound)
            lp["b" + name] = jax.random.uniform(next(keys), (1, out_f), jnp.float32,
                                                -bound, bound)
        layers.append(lp)
    bound = 1.0 / math.sqrt(E)
    b_out = jax.random.uniform(next(keys), (1, V), jnp.float32, -bound, bound)
    return {"embedding": embedding, "layers": layers, "b_out": b_out}


def pack_params(cfg: Config, params):
    """One-time packing into stacked, lane-dense kernel operands (weights bf16)."""
    V, E, M, L = cfg.vocab_size, cfg.embed_dim, cfg.mlp_dim, cfg.n_layers
    EP, MP, VP = _round_up_lanes(E), _round_up_lanes(M), _round_up_lanes(V)
    scale = 1.0 / math.sqrt(E)
    emb = params["embedding"]

    emb_pad = jnp.zeros((V, EP), jnp.float32).at[:, :E].set(emb)      # f32 table (tiny)
    wqkv = jnp.zeros((L, EP, 3 * EP), jnp.float32)
    bqkv = jnp.zeros((L, 1, 3 * EP), jnp.float32)
    wfc = jnp.zeros((L, EP, MP), jnp.float32)
    bfc = jnp.zeros((L, 1, MP), jnp.float32)
    wfo = jnp.zeros((L, MP, EP), jnp.float32)
    bfo = jnp.zeros((L, 1, EP), jnp.float32)
    for l, p in enumerate(params["layers"]):
        wqkv = wqkv.at[l, :E, 0:E].set(p["wq"] * scale)               # scale folded into Q
        wqkv = wqkv.at[l, :E, EP:EP + E].set(p["wk"])
        wqkv = wqkv.at[l, :E, 2 * EP:2 * EP + E].set(p["wv"])
        bqkv = bqkv.at[l, :, 0:E].set(p["bq"] * scale)
        bqkv = bqkv.at[l, :, EP:EP + E].set(p["bk"])
        bqkv = bqkv.at[l, :, 2 * EP:2 * EP + E].set(p["bv"])
        wfc = wfc.at[l, :E, :M].set(p["wfc"])
        bfc = bfc.at[l, :, :M].set(p["bfc"])
        wfo = wfo.at[l, :M, :E].set(p["wfo"])
        bfo = bfo.at[l, :, :E].set(p["bfo"])
    # tied output projection: embedding.T materialized (and padded) once here
    wout = jnp.zeros((EP, VP), jnp.float32).at[:E, :V].set(emb.T)
    bout = jnp.zeros((1, VP), jnp.float32).at[:, :V].set(params["b_out"])

    return {"emb_pad": emb_pad,
            "wqkv": wqkv.astype(jnp.bfloat16), "bqkv": bqkv,          # MXU operands bf16
            "wfc": wfc.astype(jnp.bfloat16), "bfc": bfc,
            "wfo": wfo.astype(jnp.bfloat16), "bfo": bfo,
            "wout": wout.astype(jnp.bfloat16), "bout": bout}


# ----------------------------- pure-JAX f32 reference ------------------------
def reference_forward(tokens, params):
    h = jnp.take(params["embedding"], tokens, axis=0)
    S = tokens.shape[1]
    mask = jnp.where(jnp.triu(jnp.ones((S, S), bool), k=1), -jnp.inf, 0.0)
    for p in params["layers"]:
        q = h @ p["wq"] + p["bq"]
        k = h @ p["wk"] + p["bk"]
        v = h @ p["wv"] + p["bv"]
        scores = q @ jnp.swapaxes(k, -1, -2) / math.sqrt(q.shape[-1]) + mask
        attn = jax.nn.softmax(scores, axis=-1) @ v
        h = h + attn
        h = h + (jax.nn.relu(h @ p["wfc"] + p["bfc"]) @ p["wfo"] + p["bfo"])
    return h @ params["embedding"].T + params["b_out"]


# ----------------------------- main ------------------------------------------
if __name__ == "__main__":
    cfg = Config(vocab_size=64, embed_dim=32, mlp_dim=64, n_layers=2)
    key = jax.random.PRNGKey(0)
    kp, kx = jax.random.split(key)

    params = init_params(cfg, kp)
    packed = pack_params(cfg, params)

    B, S = 2, 8
    tokens = jax.random.randint(kx, (B, S), 0, cfg.vocab_size, dtype=jnp.int32)

    logits = simple_llm_forward(tokens, packed, cfg)
    logits = jax.block_until_ready(logits)
    assert logits.shape == (B, S, cfg.vocab_size)

    hidden = simple_llm_forward(tokens, packed, cfg, last_hidden_state=True)
    hidden = jax.block_until_ready(hidden)
    assert hidden.shape == (B, S, cfg.embed_dim)

    # Validate against the f32 reference.  The kernel feeds the MXU bf16 operands
    # (f32 accumulation), so compare with a relative-Frobenius-norm tolerance rather
    # than elementwise 1e-3: expected ~1e-3 rel error, a broken kernel would be O(1).
    ref = reference_forward(tokens, params)
    num = float(jnp.sqrt(jnp.sum((logits - ref) ** 2)))
    den = float(jnp.sqrt(jnp.sum(ref ** 2)))
    rel_err = num / den
    assert rel_err < 2e-2, f"mismatch vs reference: relative error {rel_err}"

    print("KERNEL_OK")
</pallas_src>

<mosaic_0001>
module attributes {stable_mosaic.version = 11 : i64} {
  func.func @kernel(%arg0: i32, %arg1: memref<16xi32, #tpu.memory_space<smem>>, %arg2: memref<64x128xf32, #tpu.memory_space<vmem>>, %arg3: memref<2x128x384xbf16, #tpu.memory_space<vmem>>, %arg4: memref<2x1x384xf32, #tpu.memory_space<vmem>>, %arg5: memref<2x128x128xbf16, #tpu.memory_space<vmem>>, %arg6: memref<2x1x128xf32, #tpu.memory_space<vmem>>, %arg7: memref<2x128x128xbf16, #tpu.memory_space<vmem>>, %arg8: memref<2x1x128xf32, #tpu.memory_space<vmem>>, %arg9: memref<128x128xbf16, #tpu.memory_space<vmem>>, %arg10: memref<1x128xf32, #tpu.memory_space<vmem>>, %arg11: memref<8x128xf32, #tpu.memory_space<vmem>>, %arg12: memref<8x128xf32, #tpu.memory_space<vmem>>) attributes {dimension_semantics = [#tpu.dimension_semantics<parallel>], iteration_bounds = array<i64: 2>, scalar_prefetch = 1 : i64, scratch_operands = 1 : i64, tpu.core_type = #tpu.core_type<tc>, window_params = [{pipeline_mode = #tpu.pipeline_mode<synchronous>, transform_indices = @transform_0, window_bounds = array<i64: 64, 128>}, {pipeline_mode = #tpu.pipeline_mode<synchronous>, transform_indices = @transform_1, window_bounds = array<i64: 2, 128, 384>}, {pipeline_mode = #tpu.pipeline_mode<synchronous>, transform_indices = @transform_2, window_bounds = array<i64: 2, 1, 384>}, {pipeline_mode = #tpu.pipeline_mode<synchronous>, transform_indices = @transform_3, window_bounds = array<i64: 2, 128, 128>}, {pipeline_mode = #tpu.pipeline_mode<synchronous>, transform_indices = @transform_4, window_bounds = array<i64: 2, 1, 128>}, {pipeline_mode = #tpu.pipeline_mode<synchronous>, transform_indices = @transform_5, window_bounds = array<i64: 2, 128, 128>}, {pipeline_mode = #tpu.pipeline_mode<synchronous>, transform_indices = @transform_6, window_bounds = array<i64: 2, 1, 128>}, {pipeline_mode = #tpu.pipeline_mode<synchronous>, transform_indices = @transform_7, window_bounds = array<i64: 128, 128>}, {pipeline_mode = #tpu.pipeline_mode<synchronous>, transform_indices = @transform_8, window_bounds = array<i64: 1, 128>}, {transform_indices = @transform_9, window_bounds = array<i64: 8, 128>}]} {
    %c8_i32 = arith.constant 8 : i32
    %0 = arith.muli %arg0, %c8_i32 : i32
    %c0_i32 = arith.constant 0 : i32
    %1 = arith.addi %0, %c0_i32 : i32
    %2 = arith.index_cast %1 : i32 to index
    %3 = memref.load %arg1[%2] : memref<16xi32, #tpu.memory_space<smem>>
    %4 = arith.index_cast %3 : i32 to index
    %c0 = arith.constant 0 : index
    %5 = vector.load %arg2[%4, %c0] : memref<64x128xf32, #tpu.memory_space<vmem>>, vector<1x128xf32>
    %c0_0 = arith.constant 0 : index
    %c0_1 = arith.constant 0 : index
    %6 = vector.load %arg12[%c0_0, %c0_1] : memref<8x128xf32, #tpu.memory_space<vmem>>, vector<1x128xf32>
    tpu.vector_store %arg12[%c0_0, %c0_1], %5 {strides = array<i32>} : memref<8x128xf32, #tpu.memory_space<vmem>>, vector<1x128xf32>,
    %c8_i32_2 = arith.constant 8 : i32
    %7 = arith.muli %arg0, %c8_i32_2 : i32
    %c1_i32 = arith.constant 1 : i32
    %8 = arith.addi %7, %c1_i32 : i32
    %9 = arith.index_cast %8 : i32 to index
    %10 = memref.load %arg1[%9] : memref<16xi32, #tpu.memory_space<smem>>
    %11 = arith.index_cast %10 : i32 to index
    %c0_3 = arith.constant 0 : index
    %12 = vector.load %arg2[%11, %c0_3] : memref<64x128xf32, #tpu.memory_space<vmem>>, vector<1x128xf32>
    %c1 = arith.constant 1 : index
    %c0_4 = arith.constant 0 : index
    %13 = vector.load %arg12[%c1, %c0_4] : memref<8x128xf32, #tpu.memory_space<vmem>>, vector<1x128xf32>
    tpu.vector_store %arg12[%c1, %c0_4], %12 {strides = array<i32>} : memref<8x128xf32, #tpu.memory_space<vmem>>, vector<1x128xf32>,
    %c8_i32_5 = arith.constant 8 : i32
    %14 = arith.muli %arg0, %c8_i32_5 : i32
    %c2_i32 = arith.constant 2 : i32
    %15 = arith.addi %14, %c2_i32 : i32
    %16 = arith.index_cast %15 : i32 to index
    %17 = memref.load %arg1[%16] : memref<16xi32, #tpu.memory_space<smem>>
    %18 = arith.index_cast %17 : i32 to index
    %c0_6 = arith.constant 0 : index
    %19 = vector.load %arg2[%18, %c0_6] : memref<64x128xf32, #tpu.memory_space<vmem>>, vector<1x128xf32>
    %c2 = arith.constant 2 : index
    %c0_7 = arith.constant 0 : index
    %20 = vector.load %arg12[%c2, %c0_7] : memref<8x128xf32, #tpu.memory_space<vmem>>, vector<1x128xf32>
    tpu.vector_store %arg12[%c2, %c0_7], %19 {strides = array<i32>} : memref<8x128xf32, #tpu.memory_space<vmem>>, vector<1x128xf32>,
    %c8_i32_8 = arith.constant 8 : i32
    %21 = arith.muli %arg0, %c8_i32_8 : i32
    %c3_i32 = arith.constant 3 : i32
    %22 = arith.addi %21, %c3_i32 : i32
    %23 = arith.index_cast %22 : i32 to index
    %24 = memref.load %arg1[%23] : memref<16xi32, #tpu.memory_space<smem>>
    %25 = arith.index_cast %24 : i32 to index
    %c0_9 = arith.constant 0 : index
    %26 = vector.load %arg2[%25, %c0_9] : memref<64x128xf32, #tpu.memory_space<vmem>>, vector<1x128xf32>
    %c3 = arith.constant 3 : index
    %c0_10 = arith.constant 0 : index
    %27 = vector.load %arg12[%c3, %c0_10] : memref<8x128xf32, #tpu.memory_space<vmem>>, vector<1x128xf32>
    tpu.vector_store %arg12[%c3, %c0_10], %26 {strides = array<i32>} : memref<8x128xf32, #tpu.memory_space<vmem>>, vector<1x128xf32>,
    %c8_i32_11 = arith.constant 8 : i32
    %28 = arith.muli %arg0, %c8_i32_11 : i32
    %c4_i32 = arith.constant 4 : i32
    %29 = arith.addi %28, %c4_i32 : i32
    %30 = arith.index_cast %29 : i32 to index
    %31 = memref.load %arg1[%30] : memref<16xi32, #tpu.memory_space<smem>>
    %32 = arith.index_cast %31 : i32 to index
    %c0_12 = arith.constant 0 : index
    %33 = vector.load %arg2[%32, %c0_12] : memref<64x128xf32, #tpu.memory_space<vmem>>, vector<1x128xf32>
    %c4 = arith.constant 4 : index
    %c0_13 = arith.constant 0 : index
    %34 = vector.load %arg12[%c4, %c0_13] : memref<8x128xf32, #tpu.memory_space<vmem>>, vector<1x128xf32>
    tpu.vector_store %arg12[%c4, %c0_13], %33 {strides = array<i32>} : memref<8x128xf32, #tpu.memory_space<vmem>>, vector<1x128xf32>,
    %c8_i32_14 = arith.constant 8 : i32
    %35 = arith.muli %arg0, %c8_i32_14 : i32
    %c5_i32 = arith.constant 5 : i32
    %36 = arith.addi %35, %c5_i32 : i32
    %37 = arith.index_cast %36 : i32 to index
    %38 = memref.load %arg1[%37] : memref<16xi32, #tpu.memory_space<smem>>
    %39 = arith.index_cast %38 : i32 to index
    %c0_15 = arith.constant 0 : index
    %40 = vector.load %arg2[%39, %c0_15] : memref<64x128xf32, #tpu.memory_space<vmem>>, vector<1x128xf32>
    %c5 = arith.constant 5 : index
    %c0_16 = arith.constant 0 : index
    %41 = vector.load %arg12[%c5, %c0_16] : memref<8x128xf32, #tpu.memory_space<vmem>>, vector<1x128xf32>
    tpu.vector_store %arg12[%c5, %c0_16], %40 {strides = array<i32>} : memref<8x128xf32, #tpu.memory_space<vmem>>, vector<1x128xf32>,
    %c8_i32_17 = arith.constant 8 : i32
    %42 = arith.muli %arg0, %c8_i32_17 : i32
    %c6_i32 = arith.constant 6 : i32
    %43 = arith.addi %42, %c6_i32 : i32
    %44 = arith.index_cast %43 : i32 to index
    %45 = memref.load %arg1[%44] : memref<16xi32, #tpu.memory_space<smem>>
    %46 = arith.index_cast %45 : i32 to index
    %c0_18 = arith.constant 0 : index
    %47 = vector.load %arg2[%46, %c0_18] : memref<64x128xf32, #tpu.memory_space<vmem>>, vector<1x128xf32>
    %c6 = arith.constant 6 : index
    %c0_19 = arith.constant 0 : index
    %48 = vector.load %arg12[%c6, %c0_19] : memref<8x128xf32, #tpu.memory_space<vmem>>, vector<1x128xf32>
    tpu.vector_store %arg12[%c6, %c0_19], %47 {strides = array<i32>} : memref<8x128xf32, #tpu.memory_space<vmem>>, vector<1x128xf32>,
    %c8_i32_20 = arith.constant 8 : i32
    %49 = arith.muli %arg0, %c8_i32_20 : i32
    %c7_i32 = arith.constant 7 : i32
    %50 = arith.addi %49, %c7_i32 : i32
    %51 = arith.index_cast %50 : i32 to index
    %52 = memref.load %arg1[%51] : memref<16xi32, #tpu.memory_space<smem>>
    %53 = arith.index_cast %52 : i32 to index
    %c0_21 = arith.constant 0 : index
    %54 = vector.load %arg2[%53, %c0_21] : memref<64x128xf32, #tpu.memory_space<vmem>>, vector<1x128xf32>
    %c7 = arith.constant 7 : index
    %c0_22 = arith.constant 0 : index
    %55 = vector.load %arg12[%c7, %c0_22] : memref<8x128xf32, #tpu.memory_space<vmem>>, vector<1x128xf32>
    tpu.vector_store %arg12[%c7, %c0_22], %54 {strides = array<i32>} : memref<8x128xf32, #tpu.memory_space<vmem>>, vector<1x128xf32>,
    %c0_23 = arith.constant 0 : index
    %c0_24 = arith.constant 0 : index
    %56 = vector.load %arg12[%c0_23, %c0_24] : memref<8x128xf32, #tpu.memory_space<vmem>>, vector<8x128xf32>
    %57 = tpu.iota {dimensions = array<i32: 0>} : vector<8x8xi32>
    %58 = tpu.iota {dimensions = array<i32: 1>} : vector<8x8xi32>
    %59 = arith.cmpi sle, %58, %57 : vector<8x8xi32>
    %cst = arith.constant 0.000000e+00 : f32
    %cst_25 = arith.constant -1.000000e+30 : f32
    %60 = vector.broadcast %cst : f32 to vector<8x8xf32>
    %61 = vector.broadcast %cst_25 : f32 to vector<8x8xf32>
    %62 = arith.select %59, %60, %61 : vector<8x8xi1>, vector<8x8xf32>
    %63 = arith.truncf %56 : vector<8x128xf32> to vector<8x128xbf16>
    %c0_26 = arith.constant 0 : index
    %c0_27 = arith.constant 0 : index
    %c0_28 = arith.constant 0 : index
    %64 = vector.load %arg3[%c0_26, %c0_27, %c0_28] : memref<2x128x384xbf16, #tpu.memory_space<vmem>>, vector<1x128x384xbf16>
    %65 = vector.shape_cast %64 : vector<1x128x384xbf16> to vector<128x384xbf16>
    %cst_29 = arith.constant dense<0.000000e+00> : vector<8x384xf32>
    %66 = tpu.matmul %63, %65, %cst_29 {dimension_numbers = #tpu.dot_dimension_numbers<[1], [0], [0], [1], [0, 0, 1, 1], [], []>} : vector<8x128xbf16>, vector<128x384xbf16>, vector<8x384xf32> -> vector<8x384xf32>
    %c0_30 = arith.constant 0 : index
    %c0_31 = arith.constant 0 : index
    %c0_32 = arith.constant 0 : index
    %67 = vector.load %arg4[%c0_30, %c0_31, %c0_32] : memref<2x1x384xf32, #tpu.memory_space<vmem>>, vector<1x1x384xf32>
    %68 = vector.shape_cast %67 : vector<1x1x384xf32> to vector<1x384xf32>
    %69 = vector.broadcast %68 : vector<1x384xf32> to vector<8x384xf32>
    %70 = arith.addf %66, %69 : vector<8x384xf32>
    %71 = vector.extract_strided_slice %70 {offsets = [0, 0], sizes = [8, 128], strides = [1, 1]} : vector<8x384xf32> to vector<8x128xf32>
    %72 = vector.extract_strided_slice %70 {offsets = [0, 128], sizes = [8, 128], strides = [1, 1]} : vector<8x384xf32> to vector<8x128xf32>
    %73 = vector.extract_strided_slice %70 {offsets = [0, 256], sizes = [8, 128], strides = [1, 1]} : vector<8x384xf32> to vector<8x128xf32>
    %74 = arith.truncf %71 : vector<8x128xf32> to vector<8x128xbf16>
    %75 = arith.truncf %72 : vector<8x128xf32> to vector<8x128xbf16>
    %cst_33 = arith.constant dense<0.000000e+00> : vector<8x8xf32>
    %76 = tpu.matmul %74, %75, %cst_33 {dimension_numbers = #tpu.dot_dimension_numbers<[1], [1], [0], [0], [0, 0, 1, 0], [], []>} : vector<8x128xbf16>, vector<8x128xbf16>, vector<8x8xf32> -> vector<8x8xf32>
    %77 = arith.addf %76, %62 : vector<8x8xf32>
    %cst_34 = arith.constant dense<0xFF800000> : vector<8xf32>
    %78 = vector.multi_reduction <maximumf>, %77, %cst_34 [1] : vector<8x8xf32> to vector<8xf32>
    %79 = vector.shape_cast %78 : vector<8xf32> to vector<8x1xf32>
    %80 = vector.broadcast %79 : vector<8x1xf32> to vector<8x8xf32>
    %81 = arith.subf %77, %80 : vector<8x8xf32>
    %82 = math.exp %81 : vector<8x8xf32>
    %cst_35 = arith.constant dense<0.000000e+00> : vector<8xf32>
    %83 = vector.multi_reduction <add>, %82, %cst_35 [1] : vector<8x8xf32> to vector<8xf32>
    %84 = vector.shape_cast %83 : vector<8xf32> to vector<8x1xf32>
    %85 = tpu.reciprocal %84 {approx = true} : vector<8x1xf32> -> vector<8x1xf32>
    %86 = arith.mulf %84, %85 : vector<8x1xf32>
    %cst_36 = arith.constant 2.000000e+00 : f32
    %87 = vector.broadcast %cst_36 : f32 to vector<8x1xf32>
    %88 = arith.subf %87, %86 : vector<8x1xf32>
    %89 = arith.mulf %85, %88 : vector<8x1xf32>
    %90 = vector.broadcast %89 : vector<8x1xf32> to vector<8x8xf32>
    %91 = arith.mulf %82, %90 : vector<8x8xf32>
    %92 = arith.truncf %91 : vector<8x8xf32> to vector<8x8xbf16>
    %93 = arith.truncf %73 : vector<8x128xf32> to vector<8x128xbf16>
    %cst_37 = arith.constant dense<0.000000e+00> : vector<8x128xf32>
    %94 = tpu.matmul %92, %93, %cst_37 {dimension_numbers = #tpu.dot_dimension_numbers<[1], [0], [0], [1], [0, 0, 1, 1], [], []>} : vector<8x8xbf16>, vector<8x128xbf16>, vector<8x128xf32> -> vector<8x128xf32>
    %95 = arith.addf %56, %94 : vector<8x128xf32>
    %96 = arith.truncf %95 : vector<8x128xf32> to vector<8x128xbf16>
    %c0_38 = arith.constant 0 : index
    %c0_39 = arith.constant 0 : index
    %c0_40 = arith.constant 0 : index
    %97 = vector.load %arg5[%c0_38, %c0_39, %c0_40] : memref<2x128x128xbf16, #tpu.memory_space<vmem>>, vector<1x128x128xbf16>
    %98 = vector.shape_cast %97 : vector<1x128x128xbf16> to vector<128x128xbf16>
    %cst_41 = arith.constant dense<0.000000e+00> : vector<8x128xf32>
    %99 = tpu.matmul %96, %98, %cst_41 {dimension_numbers = #tpu.dot_dimension_numbers<[1], [0], [0], [1], [0, 0, 1, 1], [], []>} : vector<8x128xbf16>, vector<128x128xbf16>, vector<8x128xf32> -> vector<8x128xf32>
    %c0_42 = arith.constant 0 : index
    %c0_43 = arith.constant 0 : index
    %c0_44 = arith.constant 0 : index
    %100 = vector.load %arg6[%c0_42, %c0_43, %c0_44] : memref<2x1x128xf32, #tpu.memory_space<vmem>>, vector<1x1x128xf32>
    %101 = vector.shape_cast %100 : vector<1x1x128xf32> to vector<1x128xf32>
    %102 = vector.broadcast %101 : vector<1x128xf32> to vector<8x128xf32>
    %103 = arith.addf %99, %102 : vector<8x128xf32>
    %cst_45 = arith.constant 0.000000e+00 : f32
    %104 = vector.broadcast %cst_45 : f32 to vector<8x128xf32>
    %105 = arith.maximumf %103, %104 : vector<8x128xf32>
    %106 = arith.truncf %105 : vector<8x128xf32> to vector<8x128xbf16>
    %c0_46 = arith.constant 0 : index
    %c0_47 = arith.constant 0 : index
    %c0_48 = arith.constant 0 : index
    %107 = vector.load %arg7[%c0_46, %c0_47, %c0_48] : memref<2x128x128xbf16, #tpu.memory_space<vmem>>, vector<1x128x128xbf16>
    %108 = vector.shape_cast %107 : vector<1x128x128xbf16> to vector<128x128xbf16>
    %cst_49 = arith.constant dense<0.000000e+00> : vector<8x128xf32>
    %109 = tpu.matmul %106, %108, %cst_49 {dimension_numbers = #tpu.dot_dimension_numbers<[1], [0], [0], [1], [0, 0, 1, 1], [], []>} : vector<8x128xbf16>, vector<128x128xbf16>, vector<8x128xf32> -> vector<8x128xf32>
    %c0_50 = arith.constant 0 : index
    %c0_51 = arith.constant 0 : index
    %c0_52 = arith.constant 0 : index
    %110 = vector.load %arg8[%c0_50, %c0_51, %c0_52] : memref<2x1x128xf32, #tpu.memory_space<vmem>>, vector<1x1x128xf32>
    %111 = vector.shape_cast %110 : vector<1x1x128xf32> to vector<1x128xf32>
    %112 = vector.broadcast %111 : vector<1x128xf32> to vector<8x128xf32>
    %113 = arith.addf %109, %112 : vector<8x128xf32>
    %114 = arith.addf %95, %113 : vector<8x128xf32>
    %115 = arith.truncf %114 : vector<8x128xf32> to vector<8x128xbf16>
    %c1_53 = arith.constant 1 : index
    %c0_54 = arith.constant 0 : index
    %c0_55 = arith.constant 0 : index
    %116 = vector.load %arg3[%c1_53, %c0_54, %c0_55] : memref<2x128x384xbf16, #tpu.memory_space<vmem>>, vector<1x128x384xbf16>
    %117 = vector.shape_cast %116 : vector<1x128x384xbf16> to vector<128x384xbf16>
    %cst_56 = arith.constant dense<0.000000e+00> : vector<8x384xf32>
    %118 = tpu.matmul %115, %117, %cst_56 {dimension_numbers = #tpu.dot_dimension_numbers<[1], [0], [0], [1], [0, 0, 1, 1], [], []>} : vector<8x128xbf16>, vector<128x384xbf16>, vector<8x384xf32> -> vector<8x384xf32>
    %c1_57 = arith.constant 1 : index
    %c0_58 = arith.constant 0 : index
    %c0_59 = arith.constant 0 : index
    %119 = vector.load %arg4[%c1_57, %c0_58, %c0_59] : memref<2x1x384xf32, #tpu.memory_space<vmem>>, vector<1x1x384xf32>
    %120 = vector.shape_cast %119 : vector<1x1x384xf32> to vector<1x384xf32>
    %121 = vector.broadcast %120 : vector<1x384xf32> to vector<8x384xf32>
    %122 = arith.addf %118, %121 : vector<8x384xf32>
    %123 = vector.extract_strided_slice %122 {offsets = [0, 0], sizes = [8, 128], strides = [1, 1]} : vector<8x384xf32> to vector<8x128xf32>
    %124 = vector.extract_strided_slice %122 {offsets = [0, 128], sizes = [8, 128], strides = [1, 1]} : vector<8x384xf32> to vector<8x128xf32>
    %125 = vector.extract_strided_slice %122 {offsets = [0, 256], sizes = [8, 128], strides = [1, 1]} : vector<8x384xf32> to vector<8x128xf32>
    %126 = arith.truncf %123 : vector<8x128xf32> to vector<8x128xbf16>
    %127 = arith.truncf %124 : vector<8x128xf32> to vector<8x128xbf16>
    %cst_60 = arith.constant dense<0.000000e+00> : vector<8x8xf32>
    %128 = tpu.matmul %126, %127, %cst_60 {dimension_numbers = #tpu.dot_dimension_numbers<[1], [1], [0], [0], [0, 0, 1, 0], [], []>} : vector<8x128xbf16>, vector<8x128xbf16>, vector<8x8xf32> -> vector<8x8xf32>
    %129 = arith.addf %128, %62 : vector<8x8xf32>
    %cst_61 = arith.constant dense<0xFF800000> : vector<8xf32>
    %130 = vector.multi_reduction <maximumf>, %129, %cst_61 [1] : vector<8x8xf32> to vector<8xf32>
    %131 = vector.shape_cast %130 : vector<8xf32> to vector<8x1xf32>
    %132 = vector.broadcast %131 : vector<8x1xf32> to vector<8x8xf32>
    %133 = arith.subf %129, %132 : vector<8x8xf32>
    %134 = math.exp %133 : vector<8x8xf32>
    %cst_62 = arith.constant dense<0.000000e+00> : vector<8xf32>
    %135 = vector.multi_reduction <add>, %134, %cst_62 [1] : vector<8x8xf32> to vector<8xf32>
    %136 = vector.shape_cast %135 : vector<8xf32> to vector<8x1xf32>
    %137 = tpu.reciprocal %136 {approx = true} : vector<8x1xf32> -> vector<8x1xf32>
    %138 = arith.mulf %136, %137 : vector<8x1xf32>
    %cst_63 = arith.constant 2.000000e+00 : f32
    %139 = vector.broadcast %cst_63 : f32 to vector<8x1xf32>
    %140 = arith.subf %139, %138 : vector<8x1xf32>
    %141 = arith.mulf %137, %140 : vector<8x1xf32>
    %142 = vector.broadcast %141 : vector<8x1xf32> to vector<8x8xf32>
    %143 = arith.mulf %134, %142 : vector<8x8xf32>
    %144 = arith.truncf %143 : vector<8x8xf32> to vector<8x8xbf16>
    %145 = arith.truncf %125 : vector<8x128xf32> to vector<8x128xbf16>
    %cst_64 = arith.constant dense<0.000000e+00> : vector<8x128xf32>
    %146 = tpu.matmul %144, %145, %cst_64 {dimension_numbers = #tpu.dot_dimension_numbers<[1], [0], [0], [1], [0, 0, 1, 1], [], []>} : vector<8x8xbf16>, vector<8x128xbf16>, vector<8x128xf32> -> vector<8x128xf32>
    %147 = arith.addf %114, %146 : vector<8x128xf32>
    %148 = arith.truncf %147 : vector<8x128xf32> to vector<8x128xbf16>
    %c1_65 = arith.constant 1 : index
    %c0_66 = arith.constant 0 : index
    %c0_67 = arith.constant 0 : index
    %149 = vector.load %arg5[%c1_65, %c0_66, %c0_67] : memref<2x128x128xbf16, #tpu.memory_space<vmem>>, vector<1x128x128xbf16>
    %150 = vector.shape_cast %149 : vector<1x128x128xbf16> to vector<128x128xbf16>
    %cst_68 = arith.constant dense<0.000000e+00> : vector<8x128xf32>
    %151 = tpu.matmul %148, %150, %cst_68 {dimension_numbers = #tpu.dot_dimension_numbers<[1], [0], [0], [1], [0, 0, 1, 1], [], []>} : vector<8x128xbf16>, vector<128x128xbf16>, vector<8x128xf32> -> vector<8x128xf32>
    %c1_69 = arith.constant 1 : index
    %c0_70 = arith.constant 0 : index
    %c0_71 = arith.constant 0 : index
    %152 = vector.load %arg6[%c1_69, %c0_70, %c0_71] : memref<2x1x128xf32, #tpu.memory_space<vmem>>, vector<1x1x128xf32>
    %153 = vector.shape_cast %152 : vector<1x1x128xf32> to vector<1x128xf32>
    %154 = vector.broadcast %153 : vector<1x128xf32> to vector<8x128xf32>
    %155 = arith.addf %151, %154 : vector<8x128xf32>
    %cst_72 = arith.constant 0.000000e+00 : f32
    %156 = vector.broadcast %cst_72 : f32 to vector<8x128xf32>
    %157 = arith.maximumf %155, %156 : vector<8x128xf32>
    %158 = arith.truncf %157 : vector<8x128xf32> to vector<8x128xbf16>
    %c1_73 = arith.constant 1 : index
    %c0_74 = arith.constant 0 : index
    %c0_75 = arith.constant 0 : index
    %159 = vector.load %arg7[%c1_73, %c0_74, %c0_75] : memref<2x128x128xbf16, #tpu.memory_space<vmem>>, vector<1x128x128xbf16>
    %160 = vector.shape_cast %159 : vector<1x128x128xbf16> to vector<128x128xbf16>
    %cst_76 = arith.constant dense<0.000000e+00> : vector<8x128xf32>
    %161 = tpu.matmul %158, %160, %cst_76 {dimension_numbers = #tpu.dot_dimension_numbers<[1], [0], [0], [1], [0, 0, 1, 1], [], []>} : vector<8x128xbf16>, vector<128x128xbf16>, vector<8x128xf32> -> vector<8x128xf32>
    %c1_77 = arith.constant 1 : index
    %c0_78 = arith.constant 0 : index
    %c0_79 = arith.constant 0 : index
    %162 = vector.load %arg8[%c1_77, %c0_78, %c0_79] : memref<2x1x128xf32, #tpu.memory_space<vmem>>, vector<1x1x128xf32>
    %163 = vector.shape_cast %162 : vector<1x1x128xf32> to vector<1x128xf32>
    %164 = vector.broadcast %163 : vector<1x128xf32> to vector<8x128xf32>
    %165 = arith.addf %161, %164 : vector<8x128xf32>
    %166 = arith.addf %147, %165 : vector<8x128xf32>
    %167 = arith.truncf %166 : vector<8x128xf32> to vector<8x128xbf16>
    %c0_80 = arith.constant 0 : index
    %c0_81 = arith.constant 0 : index
    %168 = vector.load %arg9[%c0_80, %c0_81] : memref<128x128xbf16, #tpu.memory_space<vmem>>, vector<128x128xbf16>
    %cst_82 = arith.constant dense<0.000000e+00> : vector<8x128xf32>
    %169 = tpu.matmul %167, %168, %cst_82 {dimension_numbers = #tpu.dot_dimension_numbers<[1], [0], [0], [1], [0, 0, 1, 1], [], []>} : vector<8x128xbf16>, vector<128x128xbf16>, vector<8x128xf32> -> vector<8x128xf32>
    %c0_83 = arith.constant 0 : index
    %c0_84 = arith.constant 0 : index
    %170 = vector.load %arg10[%c0_83, %c0_84] : memref<1x128xf32, #tpu.memory_space<vmem>>, vector<1x128xf32>
    %171 = vector.broadcast %170 : vector<1x128xf32> to vector<8x128xf32>
    %172 = arith.addf %169, %171 : vector<8x128xf32>
    %c0_85 = arith.constant 0 : index
    %c0_86 = arith.constant 0 : index
    %173 = vector.load %arg11[%c0_85, %c0_86] : memref<8x128xf32, #tpu.memory_space<vmem>>, vector<8x128xf32>
    tpu.vector_store %arg11[%c0_85, %c0_86], %172 {strides = array<i32>} : memref<8x128xf32, #tpu.memory_space<vmem>>, vector<8x128xf32>,
    return
  }
  func.func @transform_0(%arg0: i32, %arg1: memref<16xi32, #tpu.memory_space<smem>>) -> (i32, i32) {
    %c0_i32 = arith.constant 0 : i32
    %c0_i32_0 = arith.constant 0 : i32
    %c0_i32_1 = arith.constant 0 : i32
    return %c0_i32, %c0_i32_0 : i32, i32
  }
  func.func @transform_1(%arg0: i32, %arg1: memref<16xi32, #tpu.memory_space<smem>>) -> (i32, i32, i32) {
    %c0_i32 = arith.constant 0 : i32
    %c0_i32_0 = arith.constant 0 : i32
    %c0_i32_1 = arith.constant 0 : i32
    %c0_i32_2 = arith.constant 0 : i32
    return %c0_i32, %c0_i32_0, %c0_i32_1 : i32, i32, i32
  }
  func.func @transform_2(%arg0: i32, %arg1: memref<16xi32, #tpu.memory_space<smem>>) -> (i32, i32, i32) {
    %c0_i32 = arith.constant 0 : i32
    %c0_i32_0 = arith.constant 0 : i32
    %c0_i32_1 = arith.constant 0 : i32
    %c0_i32_2 = arith.constant 0 : i32
    return %c0_i32, %c0_i32_0, %c0_i32_1 : i32, i32, i32
  }
  func.func @transform_3(%arg0: i32, %arg1: memref<16xi32, #tpu.memory_space<smem>>) -> (i32, i32, i32) {
    %c0_i32 = arith.constant 0 : i32
    %c0_i32_0 = arith.constant 0 : i32
    %c0_i32_1 = arith.constant 0 : i32
    %c0_i32_2 = arith.constant 0 : i32
    return %c0_i32, %c0_i32_0, %c0_i32_1 : i32, i32, i32
  }
  func.func @transform_4(%arg0: i32, %arg1: memref<16xi32, #tpu.memory_space<smem>>) -> (i32, i32, i32) {
    %c0_i32 = arith.constant 0 : i32
    %c0_i32_0 = arith.constant 0 : i32
    %c0_i32_1 = arith.constant 0 : i32
    %c0_i32_2 = arith.constant 0 : i32
    return %c0_i32, %c0_i32_0, %c0_i32_1 : i32, i32, i32
  }
  func.func @transform_5(%arg0: i32, %arg1: memref<16xi32, #tpu.memory_space<smem>>) -> (i32, i32, i32) {
    %c0_i32 = arith.constant 0 : i32
    %c0_i32_0 = arith.constant 0 : i32
    %c0_i32_1 = arith.constant 0 : i32
    %c0_i32_2 = arith.constant 0 : i32
    return %c0_i32, %c0_i32_0, %c0_i32_1 : i32, i32, i32
  }
  func.func @transform_6(%arg0: i32, %arg1: memref<16xi32, #tpu.memory_space<smem>>) -> (i32, i32, i32) {
    %c0_i32 = arith.constant 0 : i32
    %c0_i32_0 = arith.constant 0 : i32
    %c0_i32_1 = arith.constant 0 : i32
    %c0_i32_2 = arith.constant 0 : i32
    return %c0_i32, %c0_i32_0, %c0_i32_1 : i32, i32, i32
  }
  func.func @transform_7(%arg0: i32, %arg1: memref<16xi32, #tpu.memory_space<smem>>) -> (i32, i32) {
    %c0_i32 = arith.constant 0 : i32
    %c0_i32_0 = arith.constant 0 : i32
    %c0_i32_1 = arith.constant 0 : i32
    return %c0_i32, %c0_i32_0 : i32, i32
  }
  func.func @transform_8(%arg0: i32, %arg1: memref<16xi32, #tpu.memory_space<smem>>) -> (i32, i32) {
    %c0_i32 = arith.constant 0 : i32
    %c0_i32_0 = arith.constant 0 : i32
    %c0_i32_1 = arith.constant 0 : i32
    return %c0_i32, %c0_i32_0 : i32, i32
  }
  func.func @transform_9(%arg0: i32, %arg1: memref<16xi32, #tpu.memory_space<smem>>) -> (i32, i32) {
    %c0_i32 = arith.constant 0 : i32
    %c0_i32_0 = arith.constant 0 : i32
    return %arg0, %c0_i32 : i32, i32
  }
}

</mosaic_0001>

<bundles_post_ra>
// kernel: simple_llm_forward.1
= control target key start
LH: loop header
LB: loop body
LE: loop exit
PB: predicated region body
PF: predicated region fallthrough
CT: control target
= control target key end

     0   :  { %s2970_s0 = inlined_call_operand.vmem [shape: s32[16], index: 0, kind: input, shape index: {}]   ;;  %s2971_s1 = inlined_call_operand.hbm [shape: f32[64,128], index: 1, kind: input, shape index: {}]   ;;  %s2972_s2 = inlined_call_operand.hbm [shape: bf16[2,128,384], index: 2, kind: input, shape index: {}]   ;;  %s2973_s3 = inlined_call_operand.vmem [shape: f32[2,1,384], index: 3, kind: input, shape index: {}]   ;;  %s2974_s4 = inlined_call_operand.hbm [shape: bf16[2,128,128], index: 4, kind: input, shape index: {}]   ;;  %s2975_s5 = inlined_call_operand.vmem [shape: f32[2,1,128], index: 5, kind: input, shape index: {}]   ;;  %s2976_s6 = inlined_call_operand.hbm [shape: bf16[2,128,128], index: 6, kind: input, shape index: {}]   ;;  %s2977_s7 = inlined_call_operand.vmem [shape: f32[2,1,128], index: 7, kind: input, shape index: {}]   ;;  %s2978_s8 = inlined_call_operand.hbm [shape: bf16[128,128], index: 8, kind: input, shape index: {}]   ;;  %s2979_s9 = inlined_call_operand.vmem [shape: f32[1,128], index: 9, kind: input, shape index: {}]   ;;  %s2980_s10 = inlined_call_operand.vmem [shape: f32[16,128], index: 10, kind: output, shape index: {}]  }
   0x1   :  { %s15_s15 = sshll.u32 %s2970_s0, 4  ;;  %s16_s15 = int_to_ptr.vmem [resolvable:$true] %s15_s15 }
   0x2   :  { %s2372_s16 = scalar_lea.vmem %s16_s15, 16  ;;  %p2377_p1 = scmp.lt.s32.totalorder %s16_s15, %s16_s15 }
   0x3   :  { %p2373_p0 = scmp.ne.s32.totalorder %s16_s15, %s2372_s16  ;;  %p2378_p2 = scmp.lt.s32.totalorder %s2372_s16, %s2372_s16 }
   0x5   :  { %p2379_p3 = por %p2378_p2, %p2377_p1 }
   0x7   :  { %p2380_p4 = pnand %p2379_p3, %p2373_p0 }
   0x9   :  { %2383 = shalt.err (!%p2380_p4)  }
   0xa   :  { %s2546_s17 = smov [#allocation4]  }
   0xb   :  { %18 = dma.vmem_to_smem %s16_s15, 16, %s2546_s17, [#allocation3] }
   0xc   :  { %2528 = dma.done.wait [#allocation3], 16 }
   0xd   :  { %2529 = vsyncadd [#allocation3], 4294967280 }
   0xe   :  { %20 = sfence }
   0xf   :  { %21 = vsyncpa [#allocation6], 0 }
  0x10   :  { %22 = vsyncpa [#allocation8], 0 }
  0x11   :  { %23 = vsyncpa [#allocation11], 0  ;;  %s2620_s18 = smov 0  }
  0x12 LB: > { %s2547_s0 = smov [#allocation7]   ;;  %s2626_s20 = sadd.s32 4294967295, %s2544_s18   ;;  %s2544_s18 = sphi %s2620_s18, %s29_s18  }
  0x13   : > { %s274_s19 = sshll.u32 %s2547_s0, 4  ;;  %p1841_p5 = scmp.ge.s32.totalorder %s2544_s18, 1  ;;  %s2631_s19 = int_to_ptr.vmem [resolvable:$true] %s274_s19 }
  0x14   : > { %p249_p6 = scmp.lt.s32.totalorder %s2544_s18, 3  ;;  %p2981_p7 = scmp.eq.s32.totalorder %s2626_s20, 0 }
  0x15   : > { %s2548_s23 = smov [#allocation10]   ;;  %s2549_s25 = smov [#allocation5]  }
  0x16   : > { %p2633_p8 = pnand %p1841_p5, %p249_p6  ;;  %s306_s24 = sshll.u32 %s2548_s23, 4  ;;  %s2645_s24 = int_to_ptr.vmem [resolvable:$true] %s306_s24 }
  0x17   : > { %s261_s26 = sshll.u32 %s2549_s25, 4  ;;  %s2384_s29 = scalar_lea.hbm %s2972_s2, 6144  ;;  %s2647_s26 = int_to_ptr.vmem [resolvable:$true] %s261_s26 }
  0x18   : > { %s2983_s21 = scalar_select %p2633_p8, 1, 0 }
  0x19   : > { %p2210_p9 = pneg %p2633_p8  ;;  %p2385_p11 = scmp.ne.s32.totalorder %s2972_s2, %s2384_s29 }
  0x1a   : > { %p2391_p1 = scmp.lt.u32.totalorder %s2384_s29, %s2972_s2 }
  0x1b   : > { %p2641_p10 = pnand %p2981_p7, %p2210_p9 }
  0x1d   : > { %p2657_p12 = pneg %p2641_p10 }
  0x1f   : > { %p2387_p13 = pnand %p2657_p12, %p2385_p11 }
  0x21   : > { %p2388_p0 = pneg %p2387_p13 }
  0x23   : > { %p2393_p2 = pnand %p2391_p1, %p2388_p0 }
  0x25   : > { %2396 = shalt.err (!%p2393_p2)
}
  0x26   : > { %s2397_s15 = scalar_lea.vmem %s2631_s19, 6144  ;;  %p2405_p6 = scmp.lt.s32.totalorder %s2631_s19, %s2631_s19 }
  0x27   : > { %p2398_p3 = scmp.ne.s32.totalorder %s2631_s19, %s2397_s15  ;;  %p2406_p9 = scmp.lt.s32.totalorder %s2397_s15, %s2397_s15 }
  0x29   : > { %p2400_p4 = pnand %p2398_p3, %p2657_p12  ;;  %p2407_p11 = por %p2406_p9, %p2405_p6 }
  0x2b   : > { %p2401_p5 = pneg %p2400_p4 }
  0x2d   : > { %p2408_p13 = pnand %p2407_p11, %p2401_p5 }
  0x2f   : > { %2411 = shalt.err (!%p2408_p13)
}
  0x30   : > { %s2550_s16 = smov 192   ;;  %s2551_s17 = smov 12  }
  0x31   : > { %2216 = dma.hbm_to_vmem [thread:$0]  (!%p2641_p10), %s2972_s2, 6144, %s2631_s19, [#allocation8], %s2550_s16, %s2550_s16, %s2551_s17  }
  0x32   : > { %s2412_s28 = scalar_lea.hbm %s2976_s6, 2048 }
  0x33   : > { %p2413_p0 = scmp.ne.s32.totalorder %s2976_s6, %s2412_s28  ;;  %p2419_p3 = scmp.lt.u32.totalorder %s2412_s28, %s2976_s6 }
  0x35   : > { %p2415_p1 = pnand %p2413_p0, %p2657_p12 }
  0x37   : > { %p2416_p2 = pneg %p2415_p1 }
  0x39   : > { %p2421_p4 = pnand %p2419_p3, %p2416_p2 }
  0x3b   : > { %2424 = shalt.err (!%p2421_p4)
}
  0x3c   : > { %s2425_s19 = scalar_lea.vmem %s2645_s24, 2048  ;;  %p2433_p11 = scmp.lt.s32.totalorder %s2645_s24, %s2645_s24 }
  0x3d   : > { %p2426_p5 = scmp.ne.s32.totalorder %s2645_s24, %s2425_s19  ;;  %p2434_p13 = scmp.lt.s32.totalorder %s2425_s19, %s2425_s19 }
  0x3f   : > { %p2428_p6 = pnand %p2426_p5, %p2657_p12  ;;  %p2435_p0 = por %p2434_p13, %p2433_p11 }
  0x41   : > { %p2429_p9 = pneg %p2428_p6 }
  0x43   : > { %p2436_p1 = pnand %p2435_p0, %p2429_p9 }
  0x45   : > { %2439 = shalt.err (!%p2436_p1)
}
  0x46   : > { %s2552_s14 = smov 64   ;;  %s2553_s15 = smov 4  }
  0x47   : > { %2222 = dma.hbm_to_vmem [thread:$0]  (!%p2641_p10), %s2976_s6, 2048, %s2645_s24, [#allocation11], %s2552_s14, %s2552_s14, %s2553_s15  }
  0x48   : > { %s2440_s25 = scalar_lea.hbm %s2971_s1, 1024 }
  0x49   : > { %p2441_p2 = scmp.ne.s32.totalorder %s2971_s1, %s2440_s25  ;;  %p2447_p5 = scmp.lt.u32.totalorder %s2440_s25, %s2971_s1 }
  0x4b   : > { %p2443_p3 = pnand %p2441_p2, %p2657_p12 }
  0x4d   : > { %p2444_p4 = pneg %p2443_p3 }
  0x4f   : > { %p2449_p6 = pnand %p2447_p5, %p2444_p4 }
  0x51   : > { %2452 = shalt.err (!%p2449_p6)
}
  0x52   : > { %s2453_s24 = scalar_lea.vmem %s2647_s26, 1024  ;;  %p2461_p0 = scmp.lt.s32.totalorder %s2647_s26, %s2647_s26 }
  0x53   : > { %p2454_p9 = scmp.ne.s32.totalorder %s2647_s26, %s2453_s24  ;;  %p2462_p1 = scmp.lt.s32.totalorder %s2453_s24, %s2453_s24 }
  0x55   : > { %p2456_p11 = pnand %p2454_p9, %p2657_p12  ;;  %p2463_p2 = por %p2462_p1, %p2461_p0 }
  0x57   : > { %p2457_p13 = pneg %p2456_p11 }
  0x59   : > { %p2464_p3 = pnand %p2463_p2, %p2457_p13 }
  0x5b   : > { %2467 = shalt.err (!%p2464_p3)
}
  0x5c   : > { %s2554_s11 = smov 128   ;;  %s2555_s13 = smov 8  }
  0x5d   : > { %2213 = dma.hbm_to_vmem [thread:$0]  (!%p2641_p10), %s2971_s1, 1024, %s2647_s26, [#allocation6], %s2554_s11, %s2554_s11, %s2555_s13  }
  0x5e   : > { %s2556_s17 = smov [#allocation9]   ;;  %s2557_s23 = smov [#allocation12]  }
  0x5f   : > { %s290_s0 = sshll.u32 %s2556_s17, 4  ;;  %s322_s25 = sshll.u32 %s2557_s23, 4  ;;  %s291_s0 = int_to_ptr.vmem [resolvable:$true] %s290_s0  ;;  %s2727_s25 = int_to_ptr.vmem [resolvable:$true] %s322_s25 }
  0x60   : > { %s2468_s29 = scalar_lea.hbm %s2974_s4, 2048 }
  0x61   : > { %p2469_p4 = scmp.ne.s32.totalorder %s2974_s4, %s2468_s29  ;;  %p2475_p9 = scmp.lt.u32.totalorder %s2468_s29, %s2974_s4 }
  0x63   : > { %p2471_p5 = pnand %p2469_p4, %p2657_p12 }
  0x65   : > { %p2472_p6 = pneg %p2471_p5 }
  0x67   : > { %p2477_p11 = pnand %p2475_p9, %p2472_p6 }
  0x69   : > { %2480 = shalt.err (!%p2477_p11)
}
  0x6a   : > { %s2481_s11 = scalar_lea.vmem %s291_s0, 2048  ;;  %p2489_p2 = scmp.lt.s32.totalorder %s291_s0, %s291_s0 }
  0x6b   : > { %p2482_p13 = scmp.ne.s32.totalorder %s291_s0, %s2481_s11  ;;  %p2490_p3 = scmp.lt.s32.totalorder %s2481_s11, %s2481_s11 }
  0x6d   : > { %p2484_p0 = pnand %p2482_p13, %p2657_p12  ;;  %p2491_p7 = por %p2490_p3, %p2489_p2 }
  0x6f   : > { %p2485_p1 = pneg %p2484_p0 }
  0x71   : > { %p2492_p8 = pnand %p2491_p7, %p2485_p1 }
  0x73   : > { %2495 = shalt.err (!%p2492_p8)
}
  0x74   : > { %2219 = dma.hbm_to_vmem [thread:$0]  (!%p2641_p10), %s2974_s4, 2048, %s291_s0, [#allocation8], %s2552_s14, %s2552_s14, %s2553_s15  }
  0x75   : > { %s2496_s27 = scalar_lea.hbm %s2978_s8, 1024 }
  0x76   : > { %p2497_p4 = scmp.ne.s32.totalorder %s2978_s8, %s2496_s27  ;;  %p2503_p5 = scmp.lt.u32.totalorder %s2496_s27, %s2978_s8 }
  0x78   : > { %p2499_p7 = pnand %p2497_p4, %p2657_p12 }
  0x7a   : > { %p2500_p8 = pneg %p2499_p7 }
  0x7c   : > { %p2505_p6 = pnand %p2503_p5, %p2500_p8 }
  0x7e   : > { %2508 = shalt.err (!%p2505_p6)
}
  0x7f   : > { %s2509_s0 = scalar_lea.vmem %s2727_s25, 1024  ;;  %p2517_p0 = scmp.lt.s32.totalorder %s2727_s25, %s2727_s25 }
  0x80   : > { %p2510_p9 = scmp.ne.s32.totalorder %s2727_s25, %s2509_s0  ;;  %p2518_p1 = scmp.lt.s32.totalorder %s2509_s0, %s2509_s0 }
  0x82   : > { %p2512_p11 = pnand %p2510_p9, %p2657_p12  ;;  %p2519_p2 = por %p2518_p1, %p2517_p0 }
  0x84   : > { %p2513_p13 = pneg %p2512_p11 }
  0x86   : > { %p2520_p3 = pnand %p2519_p2, %p2513_p13 }
  0x88   : > { %2523 = shalt.err (!%p2520_p3)
}
  0x89   : > { %2225 = dma.hbm_to_vmem [thread:$0]  (!%p2641_p10), %s2978_s8, 1024, %s2727_s25, [#allocation11], %s2552_s14, %s2552_s14, %s2553_s15  }
  0x8a   : > { %p2986_p4 = scmp.ne.s32.totalorder %s2983_s21, 0 }
  0x8b   : > { %p2987_p12 = scmp.eq.s32.totalorder (!%p2986_p4), %s2626_s20, 0 }
  0x8c   : > { %341 = sbr.rel (%p2986_p4) target bundleno = 3228 (0xc9c), region = 56 }
  0x93   : > { %2531 = dma.done.wait (%p2987_p12), [#allocation6], 1024   ;;  %p2988_p7 = pmov %p2987_p12 }
  0x95   : > { %2533 = vsyncadd (%p2988_p7), [#allocation6], 4294966272  ;;  %p2989_p8 = pmov %p2988_p7 }
  0x96   : > { %p2990_p5 = pmov %p2988_p7 }
  0x97   : > { %2535 = dma.done.wait (%p2989_p8), [#allocation8], 8192  }
  0x98   : > { %2537 = vsyncadd (%p2990_p5), [#allocation8], 4294959104  ;;  %p2991_p6 = pmov %p2990_p5 }
  0x99   : > { %p2992_p10 = pmov %p2990_p5 }
  0x9a   : > { %2539 = dma.done.wait (%p2991_p6), [#allocation11], 3072  }
  0x9b   : > { %2541 = vsyncadd (%p2992_p10), [#allocation11], 4294964224  ;;  %s1854_s21 = sshll.u32 %s2626_s20, 3  ;;  %v2558_v0 = vmov 0   ;;  %v2559_v1 = vmov 0.0   ;;  %vm2560_vm0 = vmmov 0   ;;  %v433_v36 = vlaneseq }
  0x9c   : > { %649 = vmatprep.mubr.bf16.mxu0 %v2558_v0  ;;  %2026 = vmatprep.subr.bf16.mxu1 %v2559_v1  ;;  %s397_s22 = sadd.s32 1, %s1854_s21  ;;  %s2793_s12 = sld [smem:[#allocation4 + %s1854_s21]]  ;;  %v2260_v2 = vld [vmem:[#allocation7 + $0x4] ss:$12 sps:$4 sm:$0xff]   ;;  %v2262_v3 = vld [vmem:[#allocation7] ss:$12 sps:$4 sm:$0xff]  }
  0x9d   : > { %s402_s14 = sadd.s32 2, %s1854_s21  ;;  %s407_s15 = sadd.s32 3, %s1854_s21  ;;  %617 = vmatprep.subr.bf16.mxu0 %v2260_v2  ;;  %v2263_v4 = vld [vmem:[#allocation7 + $0x1c] ss:$12 sps:$4 sm:$0xff]   ;;  %v2265_v5 = vld [vmem:[#allocation7 + $0x18] ss:$12 sps:$4 sm:$0xff]   ;;  %2042 = vmatprep.mubr.msk.bf16.mxu1 %vm2560_vm0, %v2559_v1 }
  0x9e   : > { %s412_s25 = sadd.s32 4, %s1854_s21  ;;  %s2795_s11 = sld [smem:[#allocation4 + %s397_s22]]  ;;  %618 = vmatpush1.bf16.msra.mxu0 %v2262_v3  ;;  %v2266_v6 = vld [vmem:[#allocation7 + $0x34] ss:$12 sps:$4 sm:$0xff]   ;;  %v2268_v7 = vld [vmem:[#allocation7 + $0x30] ss:$12 sps:$4 sm:$0xff]  }
  0x9f   : > { %s417_s13 = sadd.s32 5, %s1854_s21  ;;  %s2797_s16 = sld [smem:[#allocation4 + %s402_s14]]  ;;  %619 = vmatprep.subr.bf16.mxu0 %v2263_v4  ;;  %v2269_v8 = vld [vmem:[#allocation7 + $0x4c] ss:$12 sps:$4 sm:$0xff]   ;;  %v2271_v9 = vld [vmem:[#allocation7 + $0x48] ss:$12 sps:$4 sm:$0xff]  }
  0xa0   : > { %s422_s17 = sadd.s32 6, %s1854_s21  ;;  %s408_s23 = sld [smem:[#allocation4 + %s407_s15]]  ;;  %v2272_v10 = vld [vmem:[#allocation7 + $0x64] ss:$12 sps:$4 sm:$0xff]   ;;  %v2274_v18 = vld [vmem:[#allocation7 + $0x60] ss:$12 sps:$4 sm:$0xff]  }
  0xa1   : > { %s2799_s27 = sld [smem:[#allocation4 + %s412_s25]]  ;;  %s427_s30 = sadd.s32 7, %s1854_s21  ;;  %v2284_v20 = vld [vmem:[#allocation7 + $0x8] ss:$12 sps:$4 sm:$0xff]   ;;  %v2285_v22 = vld [vmem:[#allocation7 + $0x20] ss:$12 sps:$4 sm:$0xff]  }
  0xa2   : > { %s2801_s28 = sld [smem:[#allocation4 + %s417_s13]]  ;;  %620 = vmatpush1.bf16.msra.mxu0 %v2265_v5  ;;  %s394_s0 = scalar_lea.vmem [#allocation5], %s2793_s12  ;;  %v2275_v21 = vld [vmem:[#allocation7 + $0x7c] ss:$12 sps:$4 sm:$0xff]   ;;  %2027 = vmatpush3.bf16.msra.mxu1 %v2284_v20  ;;  %v2277_v23 = vld [vmem:[#allocation7 + $0x78] ss:$12 sps:$4 sm:$0xff]  }
  0xa3   : > { %s2803_s29 = sld [smem:[#allocation4 + %s422_s17]]  ;;  %621 = vmatprep.subr.bf16.mxu0 %v2266_v6  ;;  %v395_v11 = vld [vmem:[%s394_s0] sm:$0x1]  ;;  %2028 = vmatprep.subr.bf16.mxu1 %v2559_v1  ;;  %v2278_v24 = vld [vmem:[#allocation7 + $0x94] ss:$12 sps:$4 sm:$0xff]   ;;  %v2833_v37 = vshrl.u32 %v433_v36, 7 }
  0xa4   : > { %s2805_s24 = sld [smem:[#allocation4 + %s427_s30]]  ;;  %396 = vst [vmem:[#allocation2] sm:$0x1] %v395_v11  ;;  %s399_s19 = scalar_lea.vmem [#allocation5], %s2795_s11  ;;  %v2286_v25 = vld [vmem:[#allocation7 + $0x38] ss:$12 sps:$4 sm:$0xff]  }
  0xa5   : > { %v400_v12 = vld [vmem:[%s399_s19] sm:$0x1]  ;;  %s404_s26 = scalar_lea.vmem [#allocation5], %s2797_s16  ;;  %v2281_v27 = vld [vmem:[#allocation7 + $0xac] ss:$12 sps:$4 sm:$0xff]   ;;  %v480_v38 = vsub.s32 1, %v2833_v37 }
  0xa6   : > { %622 = vmatpush1.bf16.msra.mxu0 %v2268_v7  ;;  %v405_v13 = vld [vmem:[%s404_s26] sm:$0x1]  ;;  %s409_s21 = scalar_lea.vmem [#allocation5], %s408_s23  ;;  %401 = vst [vmem:[#allocation2 + $0x1] sm:$0x1] %v400_v12  ;;  %2029 = vmatpush3.bf16.msra.mxu1 %v2285_v22  ;;  %v476_v41 = vsub.s32 0, %v2833_v37 }
  0xa7   : > { %v410_v14 = vld [vmem:[%s409_s21] sm:$0x1]  ;;  %623 = vmatprep.subr.bf16.mxu0 %v2269_v8  ;;  %406 = vst [vmem:[#allocation2 + $0x2] sm:$0x1] %v405_v13  ;;  %s414_s22 = scalar_lea.vmem [#allocation5], %s2799_s27  ;;  %2030 = vmatprep.subr.bf16.mxu1 %v2559_v1  ;;  %v484_v51 = vsub.s32 2, %v2833_v37 }
  0xa8   : > { %411 = vst [vmem:[#allocation2 + $0x3] sm:$0x1] %v410_v14  ;;  %v415_v15 = vld [vmem:[%s414_s22] sm:$0x1]  ;;  %s419_s14 = scalar_lea.vmem [#allocation5], %s2801_s28  ;;  %vm760_vm1 = vcmask 1043456  }
  0xa9   : > { %v420_v16 = vld [vmem:[%s419_s14] sm:$0x1]  ;;  %s424_s12 = scalar_lea.vmem [#allocation5], %s2803_s29  ;;  %416 = vst [vmem:[#allocation2 + $0x4] sm:$0x1] %v415_v15  ;;  %v436_v60 = vand.u32 127, %v433_v36 }
  0xaa   : > { %v425_v17 = vld [vmem:[%s424_s12] sm:$0x1]  ;;  %421 = vst [vmem:[#allocation2 + $0x5] sm:$0x1] %v420_v16  ;;  %s429_s15 = scalar_lea.vmem [#allocation5], %s2805_s24  ;;  %624 = vmatpush1.bf16.msra.mxu0 %v2271_v9  ;;  %2031 = vmatpush3.bf16.msra.mxu1 %v2286_v25  ;;  %vm740_vm3 = vcmask 64512  }
  0xab   : > { %426 = vst [vmem:[#allocation2 + $0x6] sm:$0x1] %v425_v17  ;;  %v430_v19 = vld [vmem:[%s429_s15] sm:$0x1]  ;;  %625 = vmatprep.subr.bf16.mxu0 %v2272_v10  ;;  %v2283_v29 = vld [vmem:[#allocation7 + $0xa8] ss:$12 sps:$4 sm:$0xff]   ;;  %2032 = vmatprep.subr.bf16.mxu1 %v2559_v1  ;;  %vm437_vm2 = vcmp.le.s32.totalorder %v436_v60, %v2833_v37 }
  0xac   : > { %431 = vst [vmem:[#allocation2 + $0x7] sm:$0x1] %v430_v19  ;;  %v2280_v26 = vld [vmem:[#allocation7 + $0x90] ss:$12 sps:$4 sm:$0xff]   ;;  %v2288_v31 = vld [vmem:[#allocation7 + $0x68] ss:$12 sps:$4 sm:$0xff]  }
  0xad   : > { %v2287_v28 = vld [vmem:[#allocation7 + $0x50] ss:$12 sps:$4 sm:$0xff]   ;;  %v2289_v33 = vld [vmem:[#allocation7 + $0x80] ss:$12 sps:$4 sm:$0xff]   ;;  %v2290_v34 = vld [vmem:[#allocation7 + $0x98] ss:$12 sps:$4 sm:$0xff]  }
  0xae   : > { %626 = vmatpush1.bf16.msra.mxu0 %v2274_v18  ;;  %2033 = vmatpush3.bf16.msra.mxu1 %v2287_v28  ;;  %v2291_v35 = vld [vmem:[#allocation7 + $0xb0] ss:$12 sps:$4 sm:$0xff]   ;;  %v2561_v61 = vmov -1e+30   ;;  %v2292_v12 = vld [vmem:[#allocation9] sm:$0xff]   ;;  %v2293_v13 = vld [vmem:[#allocation9 + $0x8] sm:$0xff]  }
  0xaf   : > { %627 = vmatprep.subr.bf16.mxu0 %v2275_v21  ;;  %2034 = vmatprep.subr.bf16.mxu1 %v2559_v1  ;;  %v472_v39 = vld [vmem:[%s2973_s3] sm:$0x7]  ;;  %v2853_v62 = vsel %vm437_vm2, 0.0, %v2561_v61  ;;  %v2295_v15 = vld [vmem:[#allocation9 + $0x18] sm:$0xff]   ;;  %v2296_v16 = vld [vmem:[#allocation9 + $0x20] sm:$0xff]   ;;  %p387_p9 = scmp.lt.s32.totalorder %s2626_s20, 1 }
  0xb0   : > { %v481_v40 = vrot.slane %v472_v39, %v480_v38  ;;  %v477_v46 = vrot.slane %v472_v39, %v476_v41  ;;  %v485_v52 = vrot.slane %v472_v39, %v484_v51  ;;  %v2294_v14 = vld [vmem:[#allocation9 + $0x10] sm:$0xff]   ;;  %v2297_v17 = vld [vmem:[#allocation9 + $0x28] sm:$0xff]  }
  0xb1   : > { %v2298_v18 = vld [vmem:[#allocation9 + $0x30] sm:$0xff]   ;;  %v2301_v28 = vld [vmem:[#allocation10 + $0x8] sm:$0xff]   ;;  %s2994_s20 = smov (!%p387_p9, %s2626_s20), 1 }
  0xb2   : > { %628 = vmatpush1.bf16.msra.mxu0 %v2277_v23  ;;  %2035 = vmatpush3.bf16.msra.mxu1 %v2288_v31  ;;  %v2303_v31 = vld [vmem:[#allocation10 + $0x18] sm:$0xff]   ;;  %s1853_s19 = sshll.u32 %s2994_s20, 3 }
  0xb3   : > { %629 = vmatprep.subr.bf16.mxu0 %v2278_v24  ;;  %v2816_v30 = vld [vmem:[#allocation2] sm:$0xff]  ;;  %2036 = vmatprep.subr.bf16.mxu1 %v2559_v1  ;;  %s390_s12 = scalar_lea.vmem %s2980_s10, %s1853_s19 }
  0xb4   : > { %v439_v32 = vpack.c.bf16 %v2816_v30, %v2816_v30 }
  0xb6   : > { %630 = vmatpush1.bf16.msra.mxu0 %v2280_v26  ;;  %2037 = vmatpush3.bf16.msra.mxu1 %v2289_v33  ;;  %v2299_v26 = vld [vmem:[#allocation9 + $0x38] sm:$0xff]   ;;  %v2305_v33 = vld [vmem:[#allocation10 + $0x28] sm:$0xff]  }
  0xb7   : > { %631 = vmatprep.subr.bf16.mxu0 %v2281_v27  ;;  %2038 = vmatprep.subr.bf16.mxu1 %v2559_v1  ;;  %v2300_v27 = vld [vmem:[#allocation10] sm:$0xff]  }
  0xba   : > { %632 = vmatpush1.bf16.msra.mxu0 %v2283_v29  ;;  %2039 = vmatpush3.bf16.msra.mxu1 %v2290_v34  ;;  %v2302_v29 = vld [vmem:[#allocation10 + $0x10] sm:$0xff]  }
  0xbb   : > { %2058 = vmatprep.subr.bf16.mxu0 %v2559_v1  ;;  %2040 = vmatprep.subr.bf16.mxu1 %v2559_v1 }
  0xbd   : > { %650 = vmatmul.mubr.bf16.vlgmr.msra.gmra.mrb[0].mxu0 %v439_v32 }
  0xbe   : > { %2041 = vmatpush3.bf16.msra.mxu1 %v2291_v35  ;;  %2074 = vmatprep.mubr.msk.bf16.mxu0 %vm2560_vm0, %v2559_v1 }
  0xbf   : > { %2046 = vmatprep.subr.bf16.mxu1 %v2559_v1  ;;  %2059 = vmatpush3.bf16.msra.mxu0 %v2292_v12  ;;  %v2338_v12 = vld [vmem:[#allocation7 + $0x16c] ss:$12 sps:$4 sm:$0xff]  }
  0xc0   : > { %2060 = vmatprep.subr.bf16.mxu0 %v2559_v1 }
  0xc1   : > { %2043 = vmatmul.mubr.bf16.vlgmr.msra.gmra.mrb[0].mxu1 %v439_v32  ;;  %v2304_v32 = vld [vmem:[#allocation10 + $0x20] sm:$0xff]  }
  0xc2   : > { %2048 = vmatprep.mubr.msk.bf16.mxu1 %vm2560_vm0, %v2559_v1 }
  0xc3   : > { %2061 = vmatpush3.bf16.msra.mxu0 %v2293_v13  ;;  %v2336_v13 = vld [vmem:[#allocation7 + $0x168] ss:$12 sps:$4 sm:$0xff]  }
  0xc4   : > { %2062 = vmatprep.subr.bf16.mxu0 %v2559_v1 }
  0xc7   : > { %2063 = vmatpush3.bf16.msra.mxu0 %v2294_v14  ;;  %v2339_v14 = vld [vmem:[#allocation7 + $0x170] ss:$12 sps:$4 sm:$0xff]  }
  0xc8   : > { %2064 = vmatprep.subr.bf16.mxu0 %v2559_v1 }
  0xcb   : > { %2065 = vmatpush3.bf16.msra.mxu0 %v2295_v15  ;;  %v1889_v15 = vld [vmem:[%s2977_s7] ss:$0 sm:$0xff] }
  0xcc   : > { %2066 = vmatprep.subr.bf16.mxu0 %v2559_v1 }
  0xcf   : > { %2067 = vmatpush3.bf16.msra.mxu0 %v2296_v16 }
  0xd0   : > { %2068 = vmatprep.subr.bf16.mxu0 %v2559_v1 }
  0xd3   : > { %2069 = vmatpush3.bf16.msra.mxu0 %v2297_v17 }
  0xd4   : > { %2070 = vmatprep.subr.bf16.mxu0 %v2559_v1 }
  0xd7   : > { %2071 = vmatpush3.bf16.msra.mxu0 %v2298_v18 }
  0xd8   : > { %2072 = vmatprep.subr.bf16.mxu0 %v2559_v1 }
  0xdb   : > { %2073 = vmatpush3.bf16.msra.mxu0 %v2299_v26 }
 0x190   : > { %v651_v42 = vpop.f32.mrb[0].mxu0 }
 0x191   : > { %v653_v43 = vpop.f32.mrb[1].mxu0  ;;  %v652_v49 = vadd.f32 %v651_v42, %v477_v46  ;;  %v2314_v46 = vld [vmem:[#allocation7 + $0xdc] ss:$12 sps:$4 sm:$0xff]  }
 0x192   : > { %v654_v44 = vadd.f32 %v653_v43, %v481_v40  ;;  %v655_v45 = vpop.f32.mrb[2].mxu0  ;;  %v2306_v43 = vld [vmem:[#allocation10 + $0x30] sm:$0xff]  }
 0x193   : > { %v656_v47 = vpop.f32.mrb[3].mxu0  ;;  %v698_v50 = vpack.c.bf16 %v652_v49, %v652_v49  ;;  %v2308_v45 = vld [vmem:[#allocation7 + $0xc0] ss:$12 sps:$4 sm:$0xff]   ;;  %v2316_v49 = vld [vmem:[#allocation7 + $0xf0] ss:$12 sps:$4 sm:$0xff]  }
 0x194   : > { %v699_v48 = vpack.c.bf16 %v654_v44, %v654_v44  ;;  %v692_v53 = vpop.f32.mrb[0].mxu1  ;;  %v2307_v44 = vld [vmem:[#allocation10 + $0x38] sm:$0xff]  }
 0x195   : > { %v693_v54 = vadd.f32 %v692_v53, %v485_v52  ;;  %v2044_v55 = vpop.f32.mrb[1].mxu1  ;;  %v2312_v47 = vld [vmem:[#allocation7 + $0xd8] ss:$12 sps:$4 sm:$0xff]   ;;  %v2324_v53 = vld [vmem:[#allocation7 + $0x120] ss:$12 sps:$4 sm:$0xff]  }
 0x196   : > { %2047 = vmatpush3.bf16.xpose.msra.mxu1 %v699_v48  ;;  %v695_v56 = vpop.f32.mrb[2].mxu1  ;;  %v2318_v48 = vld [vmem:[#allocation7 + $0xf4] ss:$12 sps:$4 sm:$0xff]   ;;  %v2326_v52 = vld [vmem:[#allocation7 + $0x124] ss:$12 sps:$4 sm:$0xff]  }
 0x197   : > { %2052 = vmatprep.subr.bf16.mxu1 %v2559_v1  ;;  %v756_v57 = vpack.c.bf16 %v693_v54, %v693_v54  ;;  %v2045_v58 = vpop.f32.mrb[3].mxu1  ;;  %v2330_v54 = vld [vmem:[#allocation7 + $0x13c] ss:$12 sps:$4 sm:$0xff]   ;;  %v2328_v55 = vld [vmem:[#allocation7 + $0x138] ss:$12 sps:$4 sm:$0xff]  }
 0x198   : > { %v2334_v56 = vld [vmem:[#allocation7 + $0x154] ss:$12 sps:$4 sm:$0xff]   ;;  %v1880_v58 = vld [vmem:[%s2975_s5] ss:$0 sm:$0xff] }
 0x199   : > { %v762_v59 = vsel %vm760_vm1, %v756_v57, 0  ;;  %v2332_v57 = vld [vmem:[#allocation7 + $0x150] ss:$12 sps:$4 sm:$0xff]  }
 0x19d   : > { %2049 = vmatmul.mubr.bf16.vlgmr.msra.gmra.mrb[4].mxu1 %v698_v50  ;;  %v2320_v50 = vld [vmem:[#allocation7 + $0x108] ss:$12 sps:$4 sm:$0xff]  }
 0x19e   : > { %2054 = vmatprep.mubr.msk.bf16.mxu1 %vm2560_vm0, %v2559_v1  ;;  %2053 = vmatpush3.bf16.msra.mxu1 %v762_v59 }
 0x19f   : > { %2078 = vmatprep.subr.bf16.mxu1 %v2559_v1 }
 0x270   : > { %v734_v63 = vpop.f32.mrb[4].mxu1 }
 0x271   : > { %v735_v2 = vadd.f32 %v734_v63, %v2853_v62  ;;  %v2050_v3 = vpop.f32.mrb[5].mxu1 }
 0x272   : > { %v737_v4 = vpop.f32.mrb[6].mxu1 }
 0x273   : > { %v2051_v5 = vpop.f32.mrb[7].mxu1  ;;  %v741_v6 = vsel %vm740_vm3, %v735_v2, -inf  ;;  %v2311_v4 = vld [vmem:[#allocation7 + $0xc8] ss:$12 sps:$4 sm:$0xff]  }
 0x274   : > { %742 = vmax.xlane.f32.xlu0 %v741_v6  ;;  %v2315_v6 = vld [vmem:[#allocation7 + $0xe0] ss:$12 sps:$4 sm:$0xff]  }
 0x301   : > { %v743_v7 = vpop.xlane.xlu0 %742 }
 0x302   : > { %v744_v8 = vsub.f32 %v735_v2, %v743_v7  ;;  %v2319_v7 = vld [vmem:[#allocation7 + $0xf8] ss:$12 sps:$4 sm:$0xff]  }
 0x304   : > { %v745_v9 = vmul.f32 1.442695, %v744_v8  ;;  %v2323_v8 = vld [vmem:[#allocation7 + $0x110] ss:$12 sps:$4 sm:$0xff]  }
 0x306   : > { %2364 = vpow2.f32 %v745_v9  ;;  %v2327_v9 = vld [vmem:[#allocation7 + $0x128] ss:$12 sps:$4 sm:$0xff]  }
 0x310   : > { %v2365_v10 = vpop.eup %2364 }
 0x311   : > { %v747_v11 = vsel %vm740_vm3, %v2365_v10, 0.0 }
 0x312   : > { %748 = vadd.xlane.f32.xlu0 %v747_v11  ;;  %v2335_v11 = vld [vmem:[#allocation7 + $0x158] ss:$12 sps:$4 sm:$0xff]  }
 0x39f   : > { %v749_v19 = vpop.xlane.xlu0 %748 }
 0x3a0   : > { %2366 = vrcp.f32 %v749_v19 }
 0x3aa   : > { %v2367_v20 = vpop.eup %2366 }
 0x3ab   : > { %v751_v21 = vmul.f32 %v2367_v20, %v749_v19 }
 0x3ad   : > { %v752_v22 = vsub.f32 2.0, %v751_v21 }
 0x3af   : > { %v753_v23 = vmul.f32 %v2367_v20, %v752_v22 }
 0x3b1   : > { %v754_v24 = vmul.f32 %v2365_v10, %v753_v23  ;;  %v2331_v10 = vld [vmem:[#allocation7 + $0x140] ss:$12 sps:$4 sm:$0xff]   ;;  %v1898_v23 = vld [vmem:[%s2973_s3 + $0x3] sm:$0x7] }
 0x3b3   : > { %v755_v25 = vpack.c.bf16 %v754_v24, %v754_v24  ;;  %v1075_v24 = vrot.slane %v1898_v23, %v480_v38 }
 0x3b5   : > { %2055 = vmatmul.mubr.msk.bf16.vlgmr.msra.gmra.mrb[8].mxu1 %vm740_vm3, %v755_v25 }
 0x3b6   : > { %2094 = vmatprep.mubr.msk.bf16.mxu1 %vm2560_vm0, %v2559_v1  ;;  %2079 = vmatpush3.bf16.msra.mxu1 %v2300_v27  ;;  %v1079_v27 = vrot.slane %v1898_v23, %v484_v51 }
 0x3b7   : > { %2080 = vmatprep.subr.bf16.mxu1 %v2559_v1 }
 0x3ba   : > { %2081 = vmatpush3.bf16.msra.mxu1 %v2301_v28 }
 0x3bb   : > { %2082 = vmatprep.subr.bf16.mxu1 %v2559_v1 }
 0x3be   : > { %2083 = vmatpush3.bf16.msra.mxu1 %v2302_v29 }
 0x3bf   : > { %2084 = vmatprep.subr.bf16.mxu1 %v2559_v1 }
 0x3c2   : > { %2085 = vmatpush3.bf16.msra.mxu1 %v2303_v31 }
 0x3c3   : > { %2086 = vmatprep.subr.bf16.mxu1 %v2559_v1 }
 0x3c6   : > { %2087 = vmatpush3.bf16.msra.mxu1 %v2304_v32 }
 0x3c7   : > { %2088 = vmatprep.subr.bf16.mxu1 %v2559_v1 }
 0x3ca   : > { %2089 = vmatpush3.bf16.msra.mxu1 %v2305_v33 }
 0x3cb   : > { %2090 = vmatprep.subr.bf16.mxu1 %v2559_v1 }
 0x3ce   : > { %2091 = vmatpush3.bf16.msra.mxu1 %v2306_v43 }
 0x3cf   : > { %2092 = vmatprep.subr.bf16.mxu1 %v2559_v1 }
 0x3d2   : > { %2093 = vmatpush3.bf16.msra.mxu1 %v2307_v44 }
 0x3d3   : > { %2098 = vmatprep.subr.bf16.mxu1 %v2559_v1 }
 0x488   : > { %v798_v34 = vpop.f32.mrb[8].mxu1 }
 0x489   : > { %v2875_v35 = vadd.f32 %v798_v34, %v2816_v30  ;;  %v2056_v36 = vpop.f32.mrb[9].mxu1  ;;  %v2310_v30 = vld [vmem:[#allocation7 + $0xc4] ss:$12 sps:$4 sm:$0xff]   ;;  %v1071_v34 = vrot.slane %v1898_v23, %v476_v41 }
 0x48a   : > { %v801_v39 = vpop.f32.mrb[10].mxu1  ;;  %1211 = vmatprep.subr.bf16.mxu0 %v2310_v30  ;;  %v2360_v23 = vld [vmem:[#allocation12 + $0x20] sm:$0xff]  }
 0x48b   : > { %v805_v40 = vpack.c.bf16 %v2875_v35, %v2875_v35  ;;  %v2057_v42 = vpop.f32.mrb[11].mxu1 }
 0x48d   : > { %2075 = vmatmul.mubr.bf16.vlgmr.msra.gmra.mrb[4].mxu0 %v805_v40 }
 0x48e   : > { %1243 = vmatprep.mubr.bf16.mxu0 %v2558_v0  ;;  %1212 = vmatpush1.bf16.msra.mxu0 %v2308_v45  ;;  %v2322_v0 = vld [vmem:[#allocation7 + $0x10c] ss:$12 sps:$4 sm:$0xff]  }
 0x48f   : > { %1213 = vmatprep.subr.bf16.mxu0 %v2314_v46 }
 0x492   : > { %1214 = vmatpush1.bf16.msra.mxu0 %v2312_v47 }
 0x493   : > { %1215 = vmatprep.subr.bf16.mxu0 %v2318_v48 }
 0x496   : > { %1216 = vmatpush1.bf16.msra.mxu0 %v2316_v49 }
 0x497   : > { %1217 = vmatprep.subr.bf16.mxu0 %v2322_v0 }
 0x49a   : > { %1218 = vmatpush1.bf16.msra.mxu0 %v2320_v50 }
 0x49b   : > { %1219 = vmatprep.subr.bf16.mxu0 %v2326_v52  ;;  %v2340_v52 = vld [vmem:[#allocation9 + $0x40] sm:$0xff]  }
 0x49e   : > { %1220 = vmatpush1.bf16.msra.mxu0 %v2324_v53  ;;  %v2341_v53 = vld [vmem:[#allocation9 + $0x48] sm:$0xff]  }
 0x49f   : > { %1221 = vmatprep.subr.bf16.mxu0 %v2330_v54  ;;  %v2343_v54 = vld [vmem:[#allocation9 + $0x58] sm:$0xff]  }
 0x4a2   : > { %1222 = vmatpush1.bf16.msra.mxu0 %v2328_v55  ;;  %v2344_v55 = vld [vmem:[#allocation9 + $0x60] sm:$0xff]  }
 0x4a3   : > { %1223 = vmatprep.subr.bf16.mxu0 %v2334_v56  ;;  %v2345_v56 = vld [vmem:[#allocation9 + $0x68] sm:$0xff]  }
 0x4a6   : > { %1224 = vmatpush1.bf16.msra.mxu0 %v2332_v57  ;;  %v2346_v57 = vld [vmem:[#allocation9 + $0x70] sm:$0xff]  }
 0x4a7   : > { %1225 = vmatprep.subr.bf16.mxu0 %v2338_v12 }
 0x4aa   : > { %1226 = vmatpush1.bf16.msra.mxu0 %v2336_v13 }
 0x4ab   : > { %2130 = vmatprep.subr.bf16.mxu0 %v2559_v1 }
 0x560   : > { %v911_v59 = vpop.f32.mrb[4].mxu0 }
 0x561   : > { %v912_v60 = vadd.f32 %v1880_v58, %v911_v59  ;;  %v2076_v61 = vpop.f32.mrb[5].mxu0 }
 0x562   : > { %v914_v63 = vpop.f32.mrb[6].mxu0 }
 0x563   : > { %v917_v2 = vmax.f32 %v912_v60, 0.0  ;;  %v2077_v3 = vpop.f32.mrb[7].mxu0 }
 0x565   : > { %v918_v5 = vpack.c.bf16 %v917_v2, %v917_v2 }
 0x567   : > { %2095 = vmatmul.mubr.bf16.vlgmr.msra.gmra.mrb[12].mxu1 %v918_v5  ;;  %v2348_v5 = vld [vmem:[#allocation10 + $0x40] sm:$0xff]  }
 0x568   : > { %2099 = vmatpush3.bf16.msra.mxu1 %v2311_v4  ;;  %2114 = vmatprep.mubr.msk.bf16.mxu1 %vm2560_vm0, %v2559_v1  ;;  %v2347_v4 = vld [vmem:[#allocation9 + $0x78] sm:$0xff]  }
 0x569   : > { %2100 = vmatprep.subr.bf16.mxu1 %v2559_v1 }
 0x56c   : > { %2101 = vmatpush3.bf16.msra.mxu1 %v2315_v6  ;;  %v2349_v6 = vld [vmem:[#allocation10 + $0x48] sm:$0xff]  }
 0x56d   : > { %2102 = vmatprep.subr.bf16.mxu1 %v2559_v1 }
 0x570   : > { %2103 = vmatpush3.bf16.msra.mxu1 %v2319_v7  ;;  %v2350_v7 = vld [vmem:[#allocation10 + $0x50] sm:$0xff]  }
 0x571   : > { %2104 = vmatprep.subr.bf16.mxu1 %v2559_v1 }
 0x574   : > { %2105 = vmatpush3.bf16.msra.mxu1 %v2323_v8  ;;  %v2351_v8 = vld [vmem:[#allocation10 + $0x58] sm:$0xff]  }
 0x575   : > { %2106 = vmatprep.subr.bf16.mxu1 %v2559_v1 }
 0x578   : > { %2107 = vmatpush3.bf16.msra.mxu1 %v2327_v9  ;;  %v2352_v9 = vld [vmem:[#allocation10 + $0x60] sm:$0xff]  }
 0x579   : > { %2108 = vmatprep.subr.bf16.mxu1 %v2559_v1 }
 0x57c   : > { %2109 = vmatpush3.bf16.msra.mxu1 %v2331_v10  ;;  %v2353_v10 = vld [vmem:[#allocation10 + $0x68] sm:$0xff]  }
 0x57d   : > { %2110 = vmatprep.subr.bf16.mxu1 %v2559_v1 }
 0x580   : > { %2111 = vmatpush3.bf16.msra.mxu1 %v2335_v11 }
 0x581   : > { %2112 = vmatprep.subr.bf16.mxu1 %v2559_v1 }
 0x584   : > { %2113 = vmatpush3.bf16.msra.mxu1 %v2339_v14 }
 0x585   : > { %2118 = vmatprep.subr.bf16.mxu1 %v2559_v1 }
 0x63a   : > { %v1024_v16 = vpop.f32.mrb[12].mxu1 }
 0x63b   : > { %v1025_v17 = vadd.f32 %v1889_v15, %v1024_v16  ;;  %v2096_v18 = vpop.f32.mrb[13].mxu1 }
 0x63c   : > { %v1027_v19 = vpop.f32.mrb[14].mxu1  ;;  %v2355_v18 = vld [vmem:[#allocation10 + $0x78] sm:$0xff]  }
 0x63d   : > { %v2900_v20 = vadd.f32 %v1025_v17, %v2875_v35  ;;  %v2097_v21 = vpop.f32.mrb[15].mxu1  ;;  %v2354_v17 = vld [vmem:[#allocation10 + $0x70] sm:$0xff]   ;;  %v2356_v19 = vld [vmem:[#allocation12] sm:$0xff]  }
 0x63e   : > { %v2357_v21 = vld [vmem:[#allocation12 + $0x8] sm:$0xff]  }
 0x63f   : > { %v1031_v22 = vpack.c.bf16 %v2900_v20, %v2900_v20 }
 0x641   : > { %1244 = vmatmul.mubr.bf16.vlgmr.msra.gmra.mrb[8].mxu0 %v1031_v22  ;;  %2115 = vmatmul.mubr.bf16.vlgmr.msra.gmra.mrb[16].mxu1 %v1031_v22  ;;  %v2359_v22 = vld [vmem:[#allocation12 + $0x18] sm:$0xff]  }
 0x642   : > { %2120 = vmatprep.mubr.msk.bf16.mxu1 %vm2560_vm0, %v2559_v1  ;;  %2146 = vmatprep.mubr.msk.bf16.mxu0 %vm2560_vm0, %v2559_v1 }
 0x643   : > { %2131 = vmatpush3.bf16.msra.mxu0 %v2340_v52 }
 0x644   : > { %2132 = vmatprep.subr.bf16.mxu0 %v2559_v1 }
 0x647   : > { %2133 = vmatpush3.bf16.msra.mxu0 %v2341_v53 }
 0x648   : > { %2134 = vmatprep.subr.bf16.mxu0 %v2559_v1 }
 0x714   : > { %v1245_v25 = vpop.f32.mrb[8].mxu0  ;;  %v1286_v26 = vpop.f32.mrb[16].mxu1 }
 0x715   : > { %v1247_v28 = vpop.f32.mrb[9].mxu0  ;;  %v2116_v29 = vpop.f32.mrb[17].mxu1  ;;  %v1287_v40 = vadd.f32 %v1286_v26, %v1079_v27  ;;  %v1246_v42 = vadd.f32 %v1245_v25, %v1071_v34  ;;  %v1925_v25 = vld [vmem:[%s2975_s5 + $0x1] ss:$0 sm:$0xff] }
 0x716   : > { %v1248_v31 = vadd.f32 %v1247_v28, %v1075_v24  ;;  %v1249_v32 = vpop.f32.mrb[10].mxu0  ;;  %v1289_v33 = vpop.f32.mrb[18].mxu1  ;;  %v2361_v24 = vld [vmem:[#allocation12 + $0x28] sm:$0xff]   ;;  %v2362_v34 = vld [vmem:[#allocation12 + $0x30] sm:$0xff]  }
 0x717   : > { %v1250_v35 = vpop.f32.mrb[11].mxu0  ;;  %v2117_v36 = vpop.f32.mrb[19].mxu1  ;;  %v1349_v38 = vpack.c.bf16 %v1287_v40, %v1287_v40  ;;  %v1292_v43 = vpack.c.bf16 %v1246_v42, %v1246_v42 }
 0x718   : > { %v1293_v39 = vpack.c.bf16 %v1248_v31, %v1248_v31  ;;  %v2363_v35 = vld [vmem:[#allocation12 + $0x38] sm:$0xff]   ;;  %v1935_v36 = vld [vmem:[%s2977_s7 + $0x1] ss:$0 sm:$0xff] }
 0x719   : > { %v1354_v51 = vsel %vm760_vm1, %v1349_v38, 0 }
 0x71a   : > { %2119 = vmatpush3.bf16.xpose.msra.mxu1 %v1293_v39 }
 0x71b   : > { %2124 = vmatprep.subr.bf16.mxu1 %v2559_v1 }
 0x721   : > { %2121 = vmatmul.mubr.bf16.vlgmr.msra.gmra.mrb[20].mxu1 %v1292_v43 }
 0x722   : > { %2125 = vmatpush3.bf16.msra.mxu1 %v1354_v51  ;;  %2126 = vmatprep.mubr.msk.bf16.mxu1 %vm2560_vm0, %v2559_v1 }
 0x723   : > { %2150 = vmatprep.subr.bf16.mxu1 %v2559_v1 }
 0x7f4   : > { %v1328_v37 = vpop.f32.mrb[20].mxu1 }
 0x7f5   : > { %v1329_v41 = vadd.f32 %v1328_v37, %v2853_v62  ;;  %v2122_v44 = vpop.f32.mrb[21].mxu1  ;;  %v2342_v62 = vld [vmem:[#allocation9 + $0x50] sm:$0xff]  }
 0x7f6   : > { %v1331_v45 = vpop.f32.mrb[22].mxu1  ;;  %2135 = vmatpush3.bf16.msra.mxu0 %v2342_v62 }
 0x7f7   : > { %v2123_v30 = vpop.f32.mrb[23].mxu1  ;;  %v1334_v46 = vsel %vm740_vm3, %v1329_v41, -inf  ;;  %2136 = vmatprep.subr.bf16.mxu0 %v2559_v1 }
 0x7f8   : > { %1335 = vmax.xlane.f32.xlu1 %v1334_v46 }
 0x7fa   : > { %2137 = vmatpush3.bf16.msra.mxu0 %v2343_v54 }
 0x7fb   : > { %2138 = vmatprep.subr.bf16.mxu0 %v2559_v1 }
 0x7fe   : > { %2139 = vmatpush3.bf16.msra.mxu0 %v2344_v55 }
 0x7ff   : > { %2140 = vmatprep.subr.bf16.mxu0 %v2559_v1 }
 0x802   : > { %2141 = vmatpush3.bf16.msra.mxu0 %v2345_v56 }
 0x803   : > { %2142 = vmatprep.subr.bf16.mxu0 %v2559_v1 }
 0x806   : > { %2143 = vmatpush3.bf16.msra.mxu0 %v2346_v57 }
 0x807   : > { %2144 = vmatprep.subr.bf16.mxu0 %v2559_v1 }
 0x80a   : > { %2145 = vmatpush3.bf16.msra.mxu0 %v2347_v4 }
 0x80b   : > { %2170 = vmatprep.subr.bf16.mxu0 %v2559_v1 }
 0x885   : > { %v1336_v47 = vpop.xlane.xlu1 %1335 }
 0x886   : > { %v1337_v48 = vsub.f32 %v1329_v41, %v1336_v47 }
 0x888   : > { %v1338_v49 = vmul.f32 1.442695, %v1337_v48 }
 0x88a   : > { %2368 = vpow2.f32 %v1338_v49 }
 0x894   : > { %v2369_v0 = vpop.eup %2368 }
 0x895   : > { %v1340_v50 = vsel %vm740_vm3, %v2369_v0, 0.0 }
 0x896   : > { %1341 = vadd.xlane.f32.xlu1 %v1340_v50 }
 0x923   : > { %v1342_v58 = vpop.xlane.xlu1 %1341 }
 0x924   : > { %2370 = vrcp.f32 %v1342_v58 }
 0x92e   : > { %v2371_v59 = vpop.eup %2370 }
 0x92f   : > { %v1344_v60 = vmul.f32 %v2371_v59, %v1342_v58 }
 0x931   : > { %v1345_v61 = vsub.f32 2.0, %v1344_v60 }
 0x933   : > { %v1346_v63 = vmul.f32 %v2371_v59, %v1345_v61 }
 0x935   : > { %v1347_v2 = vmul.f32 %v2369_v0, %v1346_v63 }
 0x937   : > { %v1348_v3 = vpack.c.bf16 %v1347_v2, %v1347_v2 }
 0x939   : > { %2127 = vmatmul.mubr.msk.bf16.vlgmr.msra.gmra.mrb[24].mxu1 %vm740_vm3, %v1348_v3 }
 0x93a   : > { %2166 = vmatprep.mubr.msk.bf16.mxu1 %vm2560_vm0, %v2559_v1  ;;  %2151 = vmatpush3.bf16.msra.mxu1 %v2348_v5 }
 0x93b   : > { %2152 = vmatprep.subr.bf16.mxu1 %v2559_v1 }
 0x93e   : > { %2153 = vmatpush3.bf16.msra.mxu1 %v2349_v6 }
 0x93f   : > { %2154 = vmatprep.subr.bf16.mxu1 %v2559_v1 }
 0x942   : > { %2155 = vmatpush3.bf16.msra.mxu1 %v2350_v7 }
 0x943   : > { %2156 = vmatprep.subr.bf16.mxu1 %v2559_v1 }
 0x946   : > { %2157 = vmatpush3.bf16.msra.mxu1 %v2351_v8 }
 0x947   : > { %2158 = vmatprep.subr.bf16.mxu1 %v2559_v1 }
 0x94a   : > { %2159 = vmatpush3.bf16.msra.mxu1 %v2352_v9 }
 0x94b   : > { %2160 = vmatprep.subr.bf16.mxu1 %v2559_v1 }
 0x94e   : > { %2161 = vmatpush3.bf16.msra.mxu1 %v2353_v10 }
 0x94f   : > { %2162 = vmatprep.subr.bf16.mxu1 %v2559_v1 }
 0x952   : > { %2163 = vmatpush3.bf16.msra.mxu1 %v2354_v17 }
 0x953   : > { %2164 = vmatprep.subr.bf16.mxu1 %v2559_v1 }
 0x956   : > { %2165 = vmatpush3.bf16.msra.mxu1 %v2355_v18 }
 0xa0c   : > { %v1390_v11 = vpop.f32.mrb[24].mxu1 }
 0xa0d   : > { %v1396_v12 = vadd.f32 %v1390_v11, %v2900_v20  ;;  %v2128_v13 = vpop.f32.mrb[25].mxu1  ;;  %v2358_v20 = vld [vmem:[#allocation12 + $0x10] sm:$0xff]  }
 0xa0e   : > { %v1393_v14 = vpop.f32.mrb[26].mxu1 }
 0xa0f   : > { %v1397_v15 = vpack.c.bf16 %v1396_v12, %v1396_v12  ;;  %v2129_v16 = vpop.f32.mrb[27].mxu1 }
 0xa11   : > { %2147 = vmatmul.mubr.bf16.vlgmr.msra.gmra.mrb[12].mxu0 %v1397_v15 }
 0xa12   : > { %2186 = vmatprep.mubr.msk.bf16.mxu0 %vm2560_vm0, %v2559_v1  ;;  %2171 = vmatpush3.bf16.msra.mxu0 %v2356_v19 }
 0xa13   : > { %2172 = vmatprep.subr.bf16.mxu0 %v2559_v1 }
 0xa16   : > { %2173 = vmatpush3.bf16.msra.mxu0 %v2357_v21 }
 0xa17   : > { %2174 = vmatprep.subr.bf16.mxu0 %v2559_v1 }
 0xa1a   : > { %2175 = vmatpush3.bf16.msra.mxu0 %v2358_v20 }
 0xa1b   : > { %2176 = vmatprep.subr.bf16.mxu0 %v2559_v1 }
 0xa1e   : > { %2177 = vmatpush3.bf16.msra.mxu0 %v2359_v22 }
 0xa1f   : > { %2178 = vmatprep.subr.bf16.mxu0 %v2559_v1 }
 0xa22   : > { %2179 = vmatpush3.bf16.msra.mxu0 %v2360_v23 }
 0xa23   : > { %2180 = vmatprep.subr.bf16.mxu0 %v2559_v1 }
 0xa26   : > { %2181 = vmatpush3.bf16.msra.mxu0 %v2361_v24 }
 0xa27   : > { %2182 = vmatprep.subr.bf16.mxu0 %v2559_v1 }
 0xa2a   : > { %2183 = vmatpush3.bf16.msra.mxu0 %v2362_v34 }
 0xa2b   : > { %2184 = vmatprep.subr.bf16.mxu0 %v2559_v1  ;;  %v1944_v1 = vld [vmem:[%s2979_s9] ss:$0 sm:$0xff] }
 0xa2e   : > { %2185 = vmatpush3.bf16.msra.mxu0 %v2363_v35 }
 0xae4   : > { %v1505_v26 = vpop.f32.mrb[12].mxu0 }
 0xae5   : > { %v1506_v27 = vadd.f32 %v1925_v25, %v1505_v26  ;;  %v2148_v28 = vpop.f32.mrb[13].mxu0 }
 0xae6   : > { %v1508_v29 = vpop.f32.mrb[14].mxu0 }
 0xae7   : > { %v1511_v31 = vmax.f32 %v1506_v27, 0.0  ;;  %v2149_v32 = vpop.f32.mrb[15].mxu0 }
 0xae9   : > { %v1512_v33 = vpack.c.bf16 %v1511_v31, %v1511_v31 }
 0xaeb   : > { %2167 = vmatmul.mubr.bf16.vlgmr.msra.gmra.mrb[28].mxu1 %v1512_v33 }
 0xbbe   : > { %v1620_v39 = vpop.f32.mrb[28].mxu1 }
 0xbbf   : > { %v1621_v40 = vadd.f32 %v1935_v36, %v1620_v39  ;;  %v2168_v42 = vpop.f32.mrb[29].mxu1 }
 0xbc0   : > { %v1623_v38 = vpop.f32.mrb[30].mxu1 }
 0xbc1   : > { %v1626_v43 = vadd.f32 %v1621_v40, %v1396_v12  ;;  %v2169_v51 = vpop.f32.mrb[31].mxu1 }
 0xbc3   : > { %v1627_v37 = vpack.c.bf16 %v1626_v43, %v1626_v43 }
 0xbc5   : > { %2187 = vmatmul.mubr.bf16.vlgmr.msra.gmra.mrb[16].mxu0 %v1627_v37 }
 0xc98   : > { %v1733_v41 = vpop.f32.mrb[16].mxu0 }
 0xc99   : > { %v1734_v44 = vadd.f32 %v1944_v1, %v1733_v41  ;;  %v2188_v45 = vpop.f32.mrb[17].mxu0 }
 0xc9a   : > { %v1736_v30 = vpop.f32.mrb[18].mxu0 }
 0xc9b   : > { %1739 = vst [vmem:[%s390_s12] sm:$0xff] %v1734_v44  ;;  %v2189_v46 = vpop.f32.mrb[19].mxu0 }
 0xc9c PF: > { %s29_s18 = sadd.s32 1, %s2544_s18  }
 0xc9d   : > { %p26_p11 = scmp.ge.s32.totalorder %s29_s18, 4  }
 0xc9f   :  { %28 = sbr.rel (!%p26_p11) target bundleno = 18 (0x12), region = 118 }
 0xca6   :  { %1759 = vsyncpa [#allocation6], 1 }
 0xca7   :  { %1761 = vsyncpa [#allocation6 + $0x1], 1 }
 0xca8   :  { %1762 = vsyncpa [#allocation8], 1 }
 0xca9   :  { %1763 = vsyncpa [#allocation11], 1 }

</bundles_post_ra>
